<compile_context>
chip_gen: v5e
topology: v5e:2x2
jax: 0.10.0
libtpu: 0.0.40
codegen_flags: <defaults>
</compile_context>

<pallas_src>
import jax
import jax.numpy as jnp
from jax.experimental import pallas as pl
from jax.experimental.pallas import tpu as pltpu

EPS = 1e-5
LANES = 128
SUBLANES = 8


def _round_up(x, m):
    return (x + m - 1) // m * m


def _vmem_budget_bytes():
    # Generation-aware scoped-VMEM budget with headroom for compiler-internal
    # scratch/semaphores: ~48 MiB on v7x (64 MiB physical), ~96 MiB on v5e/v6e (128 MiB).
    cap = 64 * 2**20
    try:
        info = pltpu.get_tpu_info()
        cap = int(getattr(info, "vmem_capacity_bytes", cap))
    except Exception:
        pass
    return int(max(32 * 2**20, min(cap - 16 * 2**20, (3 * cap) // 4)))


def _pick_row_tile(m, cap_rows, mult=16):
    # Largest divisor of m that is a multiple of `mult` (sublane/bf16-pack friendly)
    # and <= cap_rows.  Falls back to the full extent (block == array dim is legal).
    if m <= cap_rows:
        return m
    for t in range(min(cap_rows, m), 0, -1):
        if m % t == 0 and t % mult == 0:
            return t
    return m


# ---------------- pass 1: folded-K conv + per-tile batch-stat partials ------------
def _conv_stats_kernel(cols_ref, w_ref, conv_ref, stats_ref):
    # One MXU contraction per tile; K axis = 9 taps x Cin (zero-padded to Kp).
    acc = jnp.dot(cols_ref[...], w_ref[...], preferred_element_type=jnp.float32)
    conv_ref[...] = acc.astype(conv_ref.dtype)          # bf16 conv cache for pass 2
    # Per-channel partial statistics for this tile (row 0: sum, row 1: sum of squares),
    # taken from the f32 MXU output before the bf16 cast.
    s = acc.sum(axis=0, keepdims=True)                   # (1, Cp)
    q = (acc * acc).sum(axis=0, keepdims=True)           # (1, Cp)
    rid = jax.lax.broadcasted_iota(jnp.int32, stats_ref.shape, 0)
    stats_ref[...] = jnp.where(rid == 0, s, 0.0) + jnp.where(rid == 1, q, 0.0)


# ---------------- pass 2: folded BN apply + ReLU + residual (pure streaming) ------
def _bn_relu_res_kernel(conv_ref, xres_ref, scale_ref, bias_ref, out_ref):
    y = conv_ref[...].astype(jnp.float32) * scale_ref[...] + bias_ref[...]
    out_ref[...] = jnp.maximum(y, 0.0) + xres_ref[...]


@jax.jit
def resblock_forward(x_nchw, w_oihw, gamma, beta):
    N, C, H, W = x_nchw.shape
    Cp = _round_up(C, LANES)            # lane-dense output channels
    K = 9 * C                           # 3x3 taps folded into the contraction axis
    Kp = _round_up(K, LANES)
    M = N * H * W
    budget = _vmem_budget_bytes()

    # -------- glue: NCHW -> NHWC, 'SAME' zero-pad, packed-K im2col (bf16) ---------
    x_nhwc = jnp.transpose(x_nchw, (0, 2, 3, 1))                     # (N,H,W,C) f32
    xp = jnp.pad(x_nhwc, ((0, 0), (1, 1), (1, 1), (0, 0)))           # (N,H+2,W+2,C)
    taps = [xp[:, dy:dy + H, dx:dx + W, :] for dy in range(3) for dx in range(3)]
    cols = jnp.concatenate(taps, axis=-1).reshape(M, K)              # (M, 9*C)
    cols = jnp.pad(cols, ((0, 0), (0, Kp - K))).astype(jnp.bfloat16)
    # TODO(synk): for large C (where the 9x im2col HBM blow-up matters) build the
    # im2col slab per-tile in VMEM from a haloed input window instead of in HBM.

    # PyTorch weight (Cout,Cin,3,3) -> (3,3,Cin,Cout) -> (9*Cin, Cout), pad, bf16.
    w_km = jnp.transpose(w_oihw, (2, 3, 1, 0)).reshape(K, C)
    w_km = jnp.pad(w_km, ((0, Kp - K), (0, Cp - C))).astype(jnp.bfloat16)

    # f32 residual, channel-padded to the lane-dense width.
    x_res = jnp.pad(x_nhwc, ((0, 0), (0, 0), (0, 0), (0, Cp - C))).reshape(M, Cp)

    # -------- pass 1 tiling --------------------------------------------------------
    # per-row VMEM: double-buffered bf16 cols/out + the f32 matmul temp.
    row_bytes1 = 4 * Kp + 8 * Cp + 4 * Cp
    cap1 = max(2 * SUBLANES, min(2048, (budget // 2) // max(row_bytes1, 1)))
    TM = _pick_row_tile(M, cap1)
    T = M // TM if M % TM == 0 else 1

    conv_bf16, stats = pl.pallas_call(
        _conv_stats_kernel,
        out_shape=(jax.ShapeDtypeStruct((M, Cp), jnp.bfloat16),
                   jax.ShapeDtypeStruct((T, SUBLANES, Cp), jnp.float32)),
        grid=(T,),
        in_specs=[
            pl.BlockSpec((TM, Kp), lambda i: (i, 0)),
            pl.BlockSpec((Kp, Cp), lambda i: (0, 0)),        # weights resident
        ],
        out_specs=(
            pl.BlockSpec((TM, Cp), lambda i: (i, 0)),
            pl.BlockSpec((None, SUBLANES, Cp), lambda i: (i, 0, 0)),
        ),
        compiler_params=pltpu.CompilerParams(
            dimension_semantics=("parallel",),   # no cross-step state -> megacore OK
            vmem_limit_bytes=budget),
        cost_estimate=pl.CostEstimate(
            flops=2 * M * Kp * Cp,
            transcendentals=0,
            bytes_accessed=M * Kp * 2 + Kp * Cp * 2 + M * Cp * 2
                           + T * SUBLANES * Cp * 4),
    )(cols, w_km)

    # -------- glue: fold partial stats -> per-channel scale / bias (tiny) ----------
    # TODO(synk): E[x^2]-mean^2 with plain f32 sums; for very large N*H*W a
    # compensated/Welford accumulation would be more robust.
    inv_m = 1.0 / float(M)
    mean = stats[:, 0, :].sum(axis=0) * inv_m
    var = jnp.maximum(stats[:, 1, :].sum(axis=0) * inv_m - mean * mean, 0.0)
    gamma_p = jnp.pad(gamma.astype(jnp.float32), (0, Cp - C))
    beta_p = jnp.pad(beta.astype(jnp.float32), (0, Cp - C))
    scale_v = gamma_p * jax.lax.rsqrt(var + EPS)
    scale = scale_v.reshape(1, Cp)
    bias = (beta_p - mean * scale_v).reshape(1, Cp)

    # -------- pass 2 tiling (VMEM-budget-sized streaming tiles) --------------------
    row_bytes2 = 2 * (2 * Cp + 4 * Cp + 4 * Cp)          # 2 buffers x (bf16 + f32 + f32)
    cap2 = max(2 * SUBLANES, min(16384, (budget // 2) // row_bytes2))
    TM2 = _pick_row_tile(M, cap2)
    T2 = M // TM2 if M % TM2 == 0 else 1

    out_flat = pl.pallas_call(
        _bn_relu_res_kernel,
        out_shape=jax.ShapeDtypeStruct((M, Cp), jnp.float32),
        grid=(T2,),
        in_specs=[
            pl.BlockSpec((TM2, Cp), lambda i: (i, 0)),
            pl.BlockSpec((TM2, Cp), lambda i: (i, 0)),
            pl.BlockSpec((1, Cp), lambda i: (0, 0)),          # scale resident
            pl.BlockSpec((1, Cp), lambda i: (0, 0)),          # bias resident
        ],
        out_specs=pl.BlockSpec((TM2, Cp), lambda i: (i, 0)),
        compiler_params=pltpu.CompilerParams(
            dimension_semantics=("parallel",),
            vmem_limit_bytes=budget),
        cost_estimate=pl.CostEstimate(
            flops=4 * M * Cp,
            transcendentals=0,
            bytes_accessed=M * Cp * (2 + 4 + 4)),
    )(conv_bf16, x_res, scale, bias)

    # -------- glue: strip channel padding, back to NCHW ----------------------------
    out_nhwc = out_flat.reshape(N, H, W, Cp)[:, :, :, :C]
    return jnp.transpose(out_nhwc, (0, 3, 1, 2))


def reference_forward(x, w, gamma, beta, matmul_dtype=jnp.float32):
    conv = jax.lax.conv_general_dilated(
        x.astype(matmul_dtype), w.astype(matmul_dtype),
        window_strides=(1, 1), padding="SAME",
        dimension_numbers=("NCHW", "OIHW", "NCHW"),
        preferred_element_type=jnp.float32)
    mean = conv.mean(axis=(0, 2, 3), keepdims=True)
    var = ((conv - mean) ** 2).mean(axis=(0, 2, 3), keepdims=True)
    bn = (conv - mean) / jnp.sqrt(var + EPS) * gamma.reshape(1, -1, 1, 1) \
         + beta.reshape(1, -1, 1, 1)
    return jnp.maximum(bn, 0.0) + x


if __name__ == "__main__":
    N, C, H, W = 2, 4, 16, 16

    key = jax.random.PRNGKey(0)
    kx, kw = jax.random.split(key)

    x = jax.random.normal(kx, (N, C, H, W), dtype=jnp.float32)

    # Deterministic parameter init mirroring the module's __init__:
    #   kaiming_normal_(nonlinearity='relu'): std = sqrt(2 / fan_in), fan_in = C*3*3
    fan_in = C * 3 * 3
    w = jnp.sqrt(2.0 / fan_in) * jax.random.normal(kw, (C, C, 3, 3), dtype=jnp.float32)
    gamma = jnp.full((C,), 0.5, dtype=jnp.float32)   # batch_norm.weight = 0.5
    beta = jnp.zeros((C,), dtype=jnp.float32)        # batch_norm.bias  = 0

    # TODO(synk): BatchNorm running_mean/running_var updates are training-side state
    # mutation, not part of the forward output, so they are not reproduced here.

    out = resblock_forward(x, w, gamma, beta)
    jax.block_until_ready(out)
    assert out.shape == (N, C, H, W)

    # Check vs a reference that also feeds the MXU bf16 operands (f32 accumulation).
    # The bf16 conv cache between the passes adds ~3e-3 post-BN quantization, hence
    # the 1e-2 tolerance here.
    ref_bf16 = reference_forward(x, w, gamma, beta, matmul_dtype=jnp.bfloat16)
    err_b = jnp.max(jnp.abs(out - ref_bf16))
    assert jnp.allclose(out, ref_bf16, atol=1e-2, rtol=1e-2), f"bf16-ref max err {err_b}"

    # Loose check vs the pure-f32 PyTorch-equivalent reference.
    ref_f32 = reference_forward(x, w, gamma, beta, matmul_dtype=jnp.float32)
    err_f = jnp.max(jnp.abs(out - ref_f32))
    assert jnp.allclose(out, ref_f32, atol=5e-2, rtol=5e-2), f"f32-ref max err {err_f}"

    print("KERNEL_OK")
</pallas_src>

<mosaic_0001>
module attributes {stable_mosaic.version = 11 : i64} {
  func.func @_conv_stats_kernel(%arg0: i32, %arg1: memref<512x128xbf16, #tpu.memory_space<vmem>>, %arg2: memref<128x128xbf16, #tpu.memory_space<vmem>>, %arg3: memref<512x128xbf16, #tpu.memory_space<vmem>>, %arg4: memref<1x8x128xf32, #tpu.memory_space<vmem>>) attributes {dimension_semantics = [#tpu.dimension_semantics<parallel>], iteration_bounds = array<i64: 1>, scalar_prefetch = 0 : i64, scratch_operands = 0 : i64, tpu.core_type = #tpu.core_type<tc>, window_params = [{transform_indices = @transform_0, window_bounds = array<i64: 512, 128>}, {pipeline_mode = #tpu.pipeline_mode<synchronous>, transform_indices = @transform_1, window_bounds = array<i64: 128, 128>}, {transform_indices = @transform_2, window_bounds = array<i64: 512, 128>}, {transform_indices = @transform_3, window_bounds = array<i64: 1, 8, 128>}]} {
    %c0 = arith.constant 0 : index
    %c0_0 = arith.constant 0 : index
    %0 = vector.load %arg1[%c0, %c0_0] : memref<512x128xbf16, #tpu.memory_space<vmem>>, vector<512x128xbf16>
    %c0_1 = arith.constant 0 : index
    %c0_2 = arith.constant 0 : index
    %1 = vector.load %arg2[%c0_1, %c0_2] : memref<128x128xbf16, #tpu.memory_space<vmem>>, vector<128x128xbf16>
    %cst = arith.constant dense<0.000000e+00> : vector<512x128xf32>
    %2 = tpu.matmul %0, %1, %cst {dimension_numbers = #tpu.dot_dimension_numbers<[1], [0], [0], [1], [0, 0, 1, 1], [], []>} : vector<512x128xbf16>, vector<128x128xbf16>, vector<512x128xf32> -> vector<512x128xf32>
    %3 = arith.truncf %2 : vector<512x128xf32> to vector<512x128xbf16>
    %c0_3 = arith.constant 0 : index
    %c0_4 = arith.constant 0 : index
    %4 = vector.load %arg3[%c0_3, %c0_4] : memref<512x128xbf16, #tpu.memory_space<vmem>>, vector<512x128xbf16>
    tpu.vector_store %arg3[%c0_3, %c0_4], %3 {strides = array<i32>} : memref<512x128xbf16, #tpu.memory_space<vmem>>, vector<512x128xbf16>,
    %cst_5 = arith.constant dense<0.000000e+00> : vector<128xf32>
    %5 = vector.multi_reduction <add>, %2, %cst_5 [0] : vector<512x128xf32> to vector<128xf32>
    %6 = vector.shape_cast %5 : vector<128xf32> to vector<1x128xf32>
    %7 = arith.mulf %2, %2 : vector<512x128xf32>
    %cst_6 = arith.constant dense<0.000000e+00> : vector<128xf32>
    %8 = vector.multi_reduction <add>, %7, %cst_6 [0] : vector<512x128xf32> to vector<128xf32>
    %9 = vector.shape_cast %8 : vector<128xf32> to vector<1x128xf32>
    %10 = tpu.iota {dimensions = array<i32: 0>} : vector<8x128xi32>
    %c0_i32 = arith.constant 0 : i32
    %11 = vector.broadcast %c0_i32 : i32 to vector<8x128xi32>
    %12 = arith.cmpi eq, %10, %11 : vector<8x128xi32>
    %cst_7 = arith.constant 0.000000e+00 : f32
    %13 = vector.shape_cast %6 : vector<1x128xf32> to vector<1x128xf32>
    %14 = vector.broadcast %13 : vector<1x128xf32> to vector<8x128xf32>
    %15 = vector.broadcast %cst_7 : f32 to vector<8x128xf32>
    %16 = arith.select %12, %14, %15 : vector<8x128xi1>, vector<8x128xf32>
    %c1_i32 = arith.constant 1 : i32
    %17 = vector.broadcast %c1_i32 : i32 to vector<8x128xi32>
    %18 = arith.cmpi eq, %10, %17 : vector<8x128xi32>
    %cst_8 = arith.constant 0.000000e+00 : f32
    %19 = vector.shape_cast %9 : vector<1x128xf32> to vector<1x128xf32>
    %20 = vector.broadcast %19 : vector<1x128xf32> to vector<8x128xf32>
    %21 = vector.broadcast %cst_8 : f32 to vector<8x128xf32>
    %22 = arith.select %18, %20, %21 : vector<8x128xi1>, vector<8x128xf32>
    %23 = arith.addf %16, %22 : vector<8x128xf32>
    %c0_9 = arith.constant 0 : index
    %c0_10 = arith.constant 0 : index
    %c0_11 = arith.constant 0 : index
    %24 = vector.load %arg4[%c0_9, %c0_10, %c0_11] : memref<1x8x128xf32, #tpu.memory_space<vmem>>, vector<1x8x128xf32>
    %25 = vector.shape_cast %24 : vector<1x8x128xf32> to vector<8x128xf32>
    %26 = vector.shape_cast %23 : vector<8x128xf32> to vector<1x8x128xf32>
    tpu.vector_store %arg4[%c0_9, %c0_10, %c0_11], %26 {strides = array<i32>} : memref<1x8x128xf32, #tpu.memory_space<vmem>>, vector<1x8x128xf32>,
    return
  }
  func.func @transform_0(%arg0: i32) -> (i32, i32) {
    %c0_i32 = arith.constant 0 : i32
    %c0_i32_0 = arith.constant 0 : i32
    return %arg0, %c0_i32 : i32, i32
  }
  func.func @transform_1(%arg0: i32) -> (i32, i32) {
    %c0_i32 = arith.constant 0 : i32
    %c0_i32_0 = arith.constant 0 : i32
    %c0_i32_1 = arith.constant 0 : i32
    return %c0_i32, %c0_i32_0 : i32, i32
  }
  func.func @transform_2(%arg0: i32) -> (i32, i32) {
    %c0_i32 = arith.constant 0 : i32
    %c0_i32_0 = arith.constant 0 : i32
    return %arg0, %c0_i32 : i32, i32
  }
  func.func @transform_3(%arg0: i32) -> (i32, i32, i32) {
    %c0_i32 = arith.constant 0 : i32
    %c0_i32_0 = arith.constant 0 : i32
    %c0_i32_1 = arith.constant 0 : i32
    return %arg0, %c0_i32, %c0_i32_0 : i32, i32, i32
  }
}

module attributes {stable_mosaic.version = 11 : i64} {
  func.func @_bn_relu_res_kernel(%arg0: i32, %arg1: memref<512x128xbf16, #tpu.memory_space<vmem>>, %arg2: memref<512x128xf32, #tpu.memory_space<vmem>>, %arg3: memref<1x128xf32, #tpu.memory_space<vmem>>, %arg4: memref<1x128xf32, #tpu.memory_space<vmem>>, %arg5: memref<512x128xf32, #tpu.memory_space<vmem>>) attributes {dimension_semantics = [#tpu.dimension_semantics<parallel>], iteration_bounds = array<i64: 1>, scalar_prefetch = 0 : i64, scratch_operands = 0 : i64, tpu.core_type = #tpu.core_type<tc>, window_params = [{transform_indices = @transform_0, window_bounds = array<i64: 512, 128>}, {transform_indices = @transform_1, window_bounds = array<i64: 512, 128>}, {pipeline_mode = #tpu.pipeline_mode<synchronous>, transform_indices = @transform_2, window_bounds = array<i64: 1, 128>}, {pipeline_mode = #tpu.pipeline_mode<synchronous>, transform_indices = @transform_3, window_bounds = array<i64: 1, 128>}, {transform_indices = @transform_4, window_bounds = array<i64: 512, 128>}]} {
    %c0 = arith.constant 0 : index
    %c0_0 = arith.constant 0 : index
    %0 = vector.load %arg1[%c0, %c0_0] : memref<512x128xbf16, #tpu.memory_space<vmem>>, vector<512x128xbf16>
    %1 = arith.extf %0 : vector<512x128xbf16> to vector<512x128xf32>
    %c0_1 = arith.constant 0 : index
    %c0_2 = arith.constant 0 : index
    %2 = vector.load %arg3[%c0_1, %c0_2] : memref<1x128xf32, #tpu.memory_space<vmem>>, vector<1x128xf32>
    %3 = vector.broadcast %2 : vector<1x128xf32> to vector<512x128xf32>
    %4 = arith.mulf %1, %3 : vector<512x128xf32>
    %c0_3 = arith.constant 0 : index
    %c0_4 = arith.constant 0 : index
    %5 = vector.load %arg4[%c0_3, %c0_4] : memref<1x128xf32, #tpu.memory_space<vmem>>, vector<1x128xf32>
    %6 = vector.broadcast %5 : vector<1x128xf32> to vector<512x128xf32>
    %7 = arith.addf %4, %6 : vector<512x128xf32>
    %cst = arith.constant 0.000000e+00 : f32
    %8 = vector.broadcast %cst : f32 to vector<512x128xf32>
    %9 = arith.maximumf %7, %8 : vector<512x128xf32>
    %c0_5 = arith.constant 0 : index
    %c0_6 = arith.constant 0 : index
    %10 = vector.load %arg2[%c0_5, %c0_6] : memref<512x128xf32, #tpu.memory_space<vmem>>, vector<512x128xf32>
    %11 = arith.addf %9, %10 : vector<512x128xf32>
    %c0_7 = arith.constant 0 : index
    %c0_8 = arith.constant 0 : index
    %12 = vector.load %arg5[%c0_7, %c0_8] : memref<512x128xf32, #tpu.memory_space<vmem>>, vector<512x128xf32>
    tpu.vector_store %arg5[%c0_7, %c0_8], %11 {strides = array<i32>} : memref<512x128xf32, #tpu.memory_space<vmem>>, vector<512x128xf32>,
    return
  }
  func.func @transform_0(%arg0: i32) -> (i32, i32) {
    %c0_i32 = arith.constant 0 : i32
    %c0_i32_0 = arith.constant 0 : i32
    return %arg0, %c0_i32 : i32, i32
  }
  func.func @transform_1(%arg0: i32) -> (i32, i32) {
    %c0_i32 = arith.constant 0 : i32
    %c0_i32_0 = arith.constant 0 : i32
    return %arg0, %c0_i32 : i32, i32
  }
  func.func @transform_2(%arg0: i32) -> (i32, i32) {
    %c0_i32 = arith.constant 0 : i32
    %c0_i32_0 = arith.constant 0 : i32
    %c0_i32_1 = arith.constant 0 : i32
    return %c0_i32, %c0_i32_0 : i32, i32
  }
  func.func @transform_3(%arg0: i32) -> (i32, i32) {
    %c0_i32 = arith.constant 0 : i32
    %c0_i32_0 = arith.constant 0 : i32
    %c0_i32_1 = arith.constant 0 : i32
    return %c0_i32, %c0_i32_0 : i32, i32
  }
  func.func @transform_4(%arg0: i32) -> (i32, i32) {
    %c0_i32 = arith.constant 0 : i32
    %c0_i32_0 = arith.constant 0 : i32
    return %arg0, %c0_i32 : i32, i32
  }
}

</mosaic_0001>

<bundles_post_ra>
// kernel: resblock_forward.2
= control target key start
LH: loop header
LB: loop body
LE: loop exit
PB: predicated region body
PF: predicated region fallthrough
CT: control target
= control target key end

     0   :  { %s1790_s1 = inlined_call_operand.vmem [shape: bf16[128,128], index: 1, kind: input, shape index: {}]   ;;  %s1791_s0 = inlined_call_operand.vmem [shape: bf16[512,128], index: 0, kind: input, shape index: {}]   ;;  %s1792_s2 = inlined_call_operand.vmem [shape: bf16[512,128], index: 2, kind: output, shape index: {0}]   ;;  %s1793_s3 = inlined_call_operand.vmem [shape: f32[1,8,128], index: 3, kind: output, shape index: {1}]  }
   0x1   :  { %v1047_v0 = vld [vmem:[%s1790_s1 + $0x38] sm:$0xff]  ;;  %v1046_v1 = vld [vmem:[%s1790_s1 + $0x30] sm:$0xff]  ;;  %v1045_v2 = vld [vmem:[%s1790_s1 + $0x28] sm:$0xff] }
   0x2   :  { %333 = vmatpush.bf16.msra.mxu0 %v1047_v0  ;;  %1239 = vmatpush.bf16.msra.mxu1 %v1047_v0  ;;  %v1044_v3 = vld [vmem:[%s1790_s1 + $0x20] sm:$0xff]  ;;  %v1043_v4 = vld [vmem:[%s1790_s1 + $0x18] sm:$0xff]  ;;  %v1042_v5 = vld [vmem:[%s1790_s1 + $0x10] sm:$0xff] }
   0x3   :  { %1240 = vmatpush.bf16.msra.mxu2 %v1047_v0  ;;  %1241 = vmatpush.bf16.msra.mxu3 %v1047_v0  ;;  %v1041_v6 = vld [vmem:[%s1790_s1 + $0x8] sm:$0xff]  ;;  %v1040_v7 = vld [vmem:[%s1790_s1] sm:$0xff]  ;;  %v1010_v13 = vld [vmem:[%s1791_s0 + $0x10] sm:$0xff] }
   0x4   :  { %v1008_v8 = vld [vmem:[%s1791_s0] sm:$0xff]  ;;  %v1009_v10 = vld [vmem:[%s1791_s0 + $0x8] sm:$0xff]  ;;  %v1018_v14 = vld [vmem:[%s1791_s0 + $0x50] sm:$0xff] }
   0x5   :  { %v1016_v9 = vld [vmem:[%s1791_s0 + $0x40] sm:$0xff]  ;;  %v1017_v11 = vld [vmem:[%s1791_s0 + $0x48] sm:$0xff]  ;;  %v1011_v16 = vld [vmem:[%s1791_s0 + $0x18] sm:$0xff] }
   0x6   :  { %334 = vmatpush.bf16.msra.mxu0 %v1046_v1  ;;  %1242 = vmatpush.bf16.msra.mxu1 %v1046_v1  ;;  %v1024_v12 = vld [vmem:[%s1791_s0 + $0x80] sm:$0xff]  ;;  %v1025_v15 = vld [vmem:[%s1791_s0 + $0x88] sm:$0xff]  ;;  %v1019_v17 = vld [vmem:[%s1791_s0 + $0x58] sm:$0xff] }
   0x7   :  { %1243 = vmatpush.bf16.msra.mxu2 %v1046_v1  ;;  %1244 = vmatpush.bf16.msra.mxu3 %v1046_v1  ;;  %v1026_v18 = vld [vmem:[%s1791_s0 + $0x90] sm:$0xff]  ;;  %v1032_v19 = vld [vmem:[%s1791_s0 + $0xc0] sm:$0xff]  ;;  %v1027_v22 = vld [vmem:[%s1791_s0 + $0x98] sm:$0xff] }
   0x8   :  { %v1012_v20 = vld [vmem:[%s1791_s0 + $0x20] sm:$0xff]  ;;  %v1033_v23 = vld [vmem:[%s1791_s0 + $0xc8] sm:$0xff]  ;;  %v1034_v27 = vld [vmem:[%s1791_s0 + $0xd0] sm:$0xff] }
   0x9   :  { %v1020_v21 = vld [vmem:[%s1791_s0 + $0x60] sm:$0xff]  ;;  %v1013_v24 = vld [vmem:[%s1791_s0 + $0x28] sm:$0xff]  ;;  %v1014_v28 = vld [vmem:[%s1791_s0 + $0x30] sm:$0xff] }
   0xa   :  { %335 = vmatpush.bf16.msra.mxu0 %v1045_v2  ;;  %1245 = vmatpush.bf16.msra.mxu1 %v1045_v2  ;;  %v1021_v25 = vld [vmem:[%s1791_s0 + $0x68] sm:$0xff]  ;;  %v1028_v26 = vld [vmem:[%s1791_s0 + $0xa0] sm:$0xff]  ;;  %v1022_v29 = vld [vmem:[%s1791_s0 + $0x70] sm:$0xff] }
   0xb   :  { %1246 = vmatpush.bf16.msra.mxu2 %v1045_v2  ;;  %1247 = vmatpush.bf16.msra.mxu3 %v1045_v2  ;;  %v1029_v30 = vld [vmem:[%s1791_s0 + $0xa8] sm:$0xff]  ;;  %v1035_v31 = vld [vmem:[%s1791_s0 + $0xd8] sm:$0xff]  ;;  %v1030_v34 = vld [vmem:[%s1791_s0 + $0xb0] sm:$0xff] }
   0xc   :  { %v1015_v32 = vld [vmem:[%s1791_s0 + $0x38] sm:$0xff]  ;;  %v1036_v35 = vld [vmem:[%s1791_s0 + $0xe0] sm:$0xff]  ;;  %v1037_v39 = vld [vmem:[%s1791_s0 + $0xe8] sm:$0xff] }
   0xd   :  { %v1023_v33 = vld [vmem:[%s1791_s0 + $0x78] sm:$0xff]  ;;  %v1038_v53 = vld [vmem:[%s1791_s0 + $0xf0] sm:$0xff] }
   0xe   :  { %336 = vmatpush.bf16.msra.mxu0 %v1044_v3  ;;  %1248 = vmatpush.bf16.msra.mxu1 %v1044_v3  ;;  %v1031_v38 = vld [vmem:[%s1791_s0 + $0xb8] sm:$0xff] }
   0xf   :  { %1249 = vmatpush.bf16.msra.mxu2 %v1044_v3  ;;  %1250 = vmatpush.bf16.msra.mxu3 %v1044_v3 }
  0x12   :  { %337 = vmatpush.bf16.msra.mxu0 %v1043_v4  ;;  %1251 = vmatpush.bf16.msra.mxu1 %v1043_v4 }
  0x13   :  { %1252 = vmatpush.bf16.msra.mxu2 %v1043_v4  ;;  %1253 = vmatpush.bf16.msra.mxu3 %v1043_v4 }
  0x16   :  { %338 = vmatpush.bf16.msra.mxu0 %v1042_v5  ;;  %1254 = vmatpush.bf16.msra.mxu1 %v1042_v5 }
  0x17   :  { %1255 = vmatpush.bf16.msra.mxu2 %v1042_v5  ;;  %1256 = vmatpush.bf16.msra.mxu3 %v1042_v5  ;;  %v1039_v5 = vld [vmem:[%s1791_s0 + $0xf8] sm:$0xff] }
  0x1a   :  { %339 = vmatpush.bf16.msra.mxu0 %v1041_v6  ;;  %1257 = vmatpush.bf16.msra.mxu1 %v1041_v6 }
  0x1b   :  { %1258 = vmatpush.bf16.msra.mxu2 %v1041_v6  ;;  %1259 = vmatpush.bf16.msra.mxu3 %v1041_v6 }
  0x1e   :  { %340 = vmatpush.bf16.msra.mxu0 %v1040_v7  ;;  %1260 = vmatpush.bf16.msra.mxu1 %v1040_v7 }
  0x1f   :  { %1261 = vmatpush.bf16.msra.mxu2 %v1040_v7  ;;  %1262 = vmatpush.bf16.msra.mxu3 %v1040_v7 }
  0x21   :  { %341 = vmatmul.bf16.vlgmr.msra.gmra.mxu0 %v1008_v8  ;;  %381 = vmatmul.bf16.vlgmr.msra.gmra.mxu1 %v1016_v9 }
  0x22   :  { %421 = vmatmul.bf16.vlgmr.msra.gmra.mxu2 %v1024_v12  ;;  %461 = vmatmul.bf16.vlgmr.msra.gmra.mxu3 %v1032_v19 }
  0x31   :  { %346 = vmatmul.bf16.gmra.mxu0 %v1009_v10  ;;  %386 = vmatmul.bf16.gmra.mxu1 %v1017_v11 }
  0x32   :  { %426 = vmatmul.bf16.gmra.mxu2 %v1025_v15  ;;  %466 = vmatmul.bf16.gmra.mxu3 %v1033_v23 }
  0x41   :  { %351 = vmatmul.bf16.gmra.mxu0 %v1010_v13  ;;  %391 = vmatmul.bf16.gmra.mxu1 %v1018_v14 }
  0x42   :  { %431 = vmatmul.bf16.gmra.mxu2 %v1026_v18  ;;  %471 = vmatmul.bf16.gmra.mxu3 %v1034_v27 }
  0x51   :  { %356 = vmatmul.bf16.gmra.mxu0 %v1011_v16  ;;  %396 = vmatmul.bf16.gmra.mxu1 %v1019_v17 }
  0x52   :  { %436 = vmatmul.bf16.gmra.mxu2 %v1027_v22  ;;  %476 = vmatmul.bf16.gmra.mxu3 %v1035_v31 }
  0x61   :  { %361 = vmatmul.bf16.gmra.mxu0 %v1012_v20  ;;  %401 = vmatmul.bf16.gmra.mxu1 %v1020_v21 }
  0x62   :  { %441 = vmatmul.bf16.gmra.mxu2 %v1028_v26  ;;  %481 = vmatmul.bf16.gmra.mxu3 %v1036_v35 }
  0x71   :  { %366 = vmatmul.bf16.gmra.mxu0 %v1013_v24  ;;  %406 = vmatmul.bf16.gmra.mxu1 %v1021_v25 }
  0x72   :  { %446 = vmatmul.bf16.gmra.mxu2 %v1029_v30  ;;  %486 = vmatmul.bf16.gmra.mxu3 %v1037_v39 }
  0x81   :  { %371 = vmatmul.bf16.gmra.mxu0 %v1014_v28  ;;  %411 = vmatmul.bf16.gmra.mxu1 %v1022_v29 }
  0x82   :  { %451 = vmatmul.bf16.gmra.mxu2 %v1030_v34  ;;  %491 = vmatmul.bf16.gmra.mxu3 %v1038_v53 }
  0x91   :  { %376 = vmatmul.bf16.gmra.mxu0 %v1015_v32  ;;  %416 = vmatmul.bf16.gmra.mxu1 %v1023_v33 }
  0x92   :  { %456 = vmatmul.bf16.gmra.mxu2 %v1031_v38  ;;  %496 = vmatmul.bf16.gmra.mxu3 %v1039_v5 }
  0x9e   :  { %v342_v36 = vpop.f32.mrf.mxu0  ;;  %v1391_v37 = vpop.f32.mrf.mxu1 }
  0x9f   :  { %v699_v40 = vmul.f32 %v342_v36, %v342_v36 }
  0xa5   :  { %v1418_v60 = vpop.f32.mrf.mxu2  ;;  %v1469_v20 = vpop.f32.mrf.mxu3 }
  0xa6   :  { %v344_v41 = vpop.f32.mrf.mxu0  ;;  %v1399_v42 = vpop.f32.mrf.mxu1 }
  0xa7   :  { %v1051_v43 = vpack.c.bf16 %v344_v41, %v342_v36  ;;  %v630_v44 = vadd.f32 %v344_v41, %v342_v36  ;;  %v700_v45 = vmul.f32 %v344_v41, %v344_v41  ;;  %v1091_v46 = vpack.c.bf16 %v1399_v42, %v1391_v37 }
  0xa9   :  { %1052 = vst [vmem:[%s1792_s2] sm:$0xff] %v1051_v43   ;;  %v763_v47 = vadd.f32 %v700_v45, %v699_v40 }
  0xaa   :  { %1215 = vst [vmem:[%s1792_s2 + $0x40] sm:$0xff] %v1091_v46  }
  0xad   :  { %v1430_v2 = vpop.f32.mrf.mxu2  ;;  %v1481_v24 = vpop.f32.mrf.mxu3 }
  0xae   :  { %v347_v48 = vpop.f32.mrf.mxu0  ;;  %v1409_v49 = vpop.f32.mrf.mxu1  ;;  %v1131_v3 = vpack.c.bf16 %v1430_v2, %v1418_v60  ;;  %v1171_v26 = vpack.c.bf16 %v1481_v24, %v1469_v20 }
  0xaf   :  { %v631_v50 = vadd.f32 %v630_v44, %v347_v48  ;;  %v701_v51 = vmul.f32 %v347_v48, %v347_v48 }
  0xb0   :  { %1223 = vst [vmem:[%s1792_s2 + $0x80] sm:$0xff] %v1131_v3  }
  0xb1   :  { %v764_v52 = vadd.f32 %v763_v47, %v701_v51  ;;  %1231 = vst [vmem:[%s1792_s2 + $0xc0] sm:$0xff] %v1171_v26  }
  0xb5   :  { %v1446_v10 = vpop.f32.mrf.mxu2  ;;  %v1499_v32 = vpop.f32.mrf.mxu3 }
  0xb6   :  { %v349_v54 = vpop.f32.mrf.mxu0  ;;  %v1414_v55 = vpop.f32.mrf.mxu1 }
  0xb7   :  { %v1056_v56 = vpack.c.bf16 %v349_v54, %v347_v48  ;;  %v632_v57 = vadd.f32 %v631_v50, %v349_v54  ;;  %v702_v58 = vmul.f32 %v349_v54, %v349_v54  ;;  %v1096_v59 = vpack.c.bf16 %v1414_v55, %v1409_v49 }
  0xb9   :  { %1208 = vst [vmem:[%s1792_s2 + $0x8] sm:$0xff] %v1056_v56   ;;  %v765_v61 = vadd.f32 %v764_v52, %v702_v58 }
  0xba   :  { %1216 = vst [vmem:[%s1792_s2 + $0x48] sm:$0xff] %v1096_v59  }
  0xbd   :  { %v1456_v13 = vpop.f32.mrf.mxu2  ;;  %v1511_v36 = vpop.f32.mrf.mxu3 }
  0xbe   :  { %v352_v62 = vpop.f32.mrf.mxu0  ;;  %v1426_v63 = vpop.f32.mrf.mxu1  ;;  %v1136_v14 = vpack.c.bf16 %v1456_v13, %v1446_v10  ;;  %v1176_v39 = vpack.c.bf16 %v1511_v36, %v1499_v32 }
  0xbf   :  { %v1428_v0 = vadd.f32 %v632_v57, %v352_v62  ;;  %v703_v1 = vmul.f32 %v352_v62, %v352_v62 }
  0xc0   :  { %1224 = vst [vmem:[%s1792_s2 + $0x88] sm:$0xff] %v1136_v14  }
  0xc1   :  { %v1434_v4 = vadd.f32 %v765_v61, %v703_v1  ;;  %1232 = vst [vmem:[%s1792_s2 + $0xc8] sm:$0xff] %v1176_v39  }
  0xc5   :  { %v1467_v19 = vpop.f32.mrf.mxu2  ;;  %v1529_v46 = vpop.f32.mrf.mxu3 }
  0xc6   :  { %v354_v6 = vpop.f32.mrf.mxu0  ;;  %v1442_v7 = vpop.f32.mrf.mxu1 }
  0xc7   :  { %v1061_v8 = vpack.c.bf16 %v354_v6, %v352_v62  ;;  %v1101_v9 = vpack.c.bf16 %v1442_v7, %v1426_v63  ;;  %v704_v52 = vmul.f32 %v354_v6, %v354_v6  ;;  %v634_v57 = vadd.f32 %v1428_v0, %v354_v6 }
  0xc9   :  { %1209 = vst [vmem:[%s1792_s2 + $0x10] sm:$0xff] %v1061_v8   ;;  %v767_v58 = vadd.f32 %v1434_v4, %v704_v52 }
  0xca   :  { %1217 = vst [vmem:[%s1792_s2 + $0x50] sm:$0xff] %v1101_v9  }
  0xcd   :  { %v1479_v23 = vpop.f32.mrf.mxu2  ;;  %v1541_v51 = vpop.f32.mrf.mxu3 }
  0xce   :  { %v357_v11 = vpop.f32.mrf.mxu0  ;;  %v1454_v12 = vpop.f32.mrf.mxu1  ;;  %v1141_v25 = vpack.c.bf16 %v1479_v23, %v1467_v19  ;;  %v1181_v54 = vpack.c.bf16 %v1541_v51, %v1529_v46 }
  0xcf   :  { %v705_v56 = vmul.f32 %v357_v11, %v357_v11  ;;  %v635_v61 = vadd.f32 %v634_v57, %v357_v11 }
  0xd0   :  { %1225 = vst [vmem:[%s1792_s2 + $0x90] sm:$0xff] %v1141_v25  }
  0xd1   :  { %1233 = vst [vmem:[%s1792_s2 + $0xd0] sm:$0xff] %v1181_v54   ;;  %v768_v62 = vadd.f32 %v767_v58, %v705_v56 }
  0xd5   :  { %v1497_v31 = vpop.f32.mrf.mxu2  ;;  %v1561_v0 = vpop.f32.mrf.mxu3 }
  0xd6   :  { %v359_v15 = vpop.f32.mrf.mxu0  ;;  %v1463_v16 = vpop.f32.mrf.mxu1 }
  0xd7   :  { %v1066_v17 = vpack.c.bf16 %v359_v15, %v357_v11  ;;  %v1106_v18 = vpack.c.bf16 %v1463_v16, %v1454_v12  ;;  %v706_v59 = vmul.f32 %v359_v15, %v359_v15  ;;  %v636_v8 = vadd.f32 %v635_v61, %v359_v15 }
  0xd9   :  { %1210 = vst [vmem:[%s1792_s2 + $0x18] sm:$0xff] %v1066_v17   ;;  %v769_v6 = vadd.f32 %v768_v62, %v706_v59 }
  0xda   :  { %1218 = vst [vmem:[%s1792_s2 + $0x58] sm:$0xff] %v1106_v18  }
  0xdd   :  { %v1509_v35 = vpop.f32.mrf.mxu2 }
  0xde   :  { %v362_v21 = vpop.f32.mrf.mxu0  ;;  %v1477_v22 = vpop.f32.mrf.mxu1  ;;  %v1146_v38 = vpack.c.bf16 %v1509_v35, %v1497_v31 }
  0xdf   :  { %v707_v1 = vmul.f32 %v362_v21, %v362_v21  ;;  %v637_v25 = vadd.f32 %v636_v8, %v362_v21 }
  0xe0   :  { %1226 = vst [vmem:[%s1792_s2 + $0x98] sm:$0xff] %v1146_v38  }
  0xe1   :  { %v770_v4 = vadd.f32 %v769_v6, %v707_v1 }
  0xe5   :  { %v1527_v45 = vpop.f32.mrf.mxu2 }
  0xe6   :  { %v364_v27 = vpop.f32.mrf.mxu0  ;;  %v1493_v28 = vpop.f32.mrf.mxu1 }
  0xe7   :  { %v1071_v29 = vpack.c.bf16 %v364_v27, %v362_v21  ;;  %v1111_v30 = vpack.c.bf16 %v1493_v28, %v1477_v22  ;;  %v708_v18 = vmul.f32 %v364_v27, %v364_v27  ;;  %v638_v15 = vadd.f32 %v637_v25, %v364_v27 }
  0xe9   :  { %1211 = vst [vmem:[%s1792_s2 + $0x20] sm:$0xff] %v1071_v29   ;;  %v771_v26 = vadd.f32 %v770_v4, %v708_v18 }
  0xea   :  { %1219 = vst [vmem:[%s1792_s2 + $0x60] sm:$0xff] %v1111_v30  }
  0xed   :  { %v1539_v50 = vpop.f32.mrf.mxu2 }
  0xee   :  { %v367_v33 = vpop.f32.mrf.mxu0  ;;  %v1507_v34 = vpop.f32.mrf.mxu1  ;;  %v1151_v53 = vpack.c.bf16 %v1539_v50, %v1527_v45 }
  0xef   :  { %v709_v11 = vmul.f32 %v367_v33, %v367_v33  ;;  %v639_v30 = vadd.f32 %v638_v15, %v367_v33 }
  0xf0   :  { %1227 = vst [vmem:[%s1792_s2 + $0xa0] sm:$0xff] %v1151_v53   ;;  %v1573_v53 = vpop.f32.mrf.mxu3 }
  0xf1   :  { %v772_v38 = vadd.f32 %v771_v26, %v709_v11  ;;  %v1186_v27 = vpack.c.bf16 %v1573_v53, %v1561_v0  ;;  %v716_v26 = vmul.f32 %v1399_v42, %v1399_v42 }
  0xf3   :  { %1234 = vst [vmem:[%s1792_s2 + $0xd8] sm:$0xff] %v1186_v27  }
  0xf5   :  { %v1559_v17 = vpop.f32.mrf.mxu2 }
  0xf6   :  { %v369_v40 = vpop.f32.mrf.mxu0  ;;  %v1523_v41 = vpop.f32.mrf.mxu1 }
  0xf7   :  { %v1076_v43 = vpack.c.bf16 %v369_v40, %v367_v33  ;;  %v1116_v44 = vpack.c.bf16 %v1523_v41, %v1507_v34  ;;  %v710_v29 = vmul.f32 %v369_v40, %v369_v40  ;;  %v640_v21 = vadd.f32 %v639_v30, %v369_v40 }
  0xf8   :  { %v1591_v4 = vpop.f32.mrf.mxu3 }
  0xf9   :  { %1212 = vst [vmem:[%s1792_s2 + $0x28] sm:$0xff] %v1076_v43   ;;  %v773_v54 = vadd.f32 %v772_v38, %v710_v29  ;;  %v717_v38 = vmul.f32 %v1409_v49, %v1409_v49 }
  0xfa   :  { %1220 = vst [vmem:[%s1792_s2 + $0x68] sm:$0xff] %v1116_v44  }
  0xfd   :  { %v1571_v52 = vpop.f32.mrf.mxu2 }
  0xfe   :  { %v372_v47 = vpop.f32.mrf.mxu0  ;;  %v1537_v48 = vpop.f32.mrf.mxu1  ;;  %v1156_v57 = vpack.c.bf16 %v1571_v52, %v1559_v17 }
  0xff   :  { %v711_v39 = vmul.f32 %v372_v47, %v372_v47  ;;  %v641_v58 = vadd.f32 %v640_v21, %v372_v47 }
 0x100   :  { %1228 = vst [vmem:[%s1792_s2 + $0xa8] sm:$0xff] %v1156_v57   ;;  %v1613_v57 = vpop.f32.mrf.mxu3 }
 0x101   :  { %v774_v33 = vadd.f32 %v773_v54, %v711_v39  ;;  %v1191_v27 = vpack.c.bf16 %v1613_v57, %v1591_v4 }
 0x103   :  { %1235 = vst [vmem:[%s1792_s2 + $0xe0] sm:$0xff] %v1191_v27  }
 0x105   :  { %v1589_v25 = vpop.f32.mrf.mxu2 }
 0x106   :  { %v374_v3 = vpop.f32.mrf.mxu0  ;;  %v1555_v5 = vpop.f32.mrf.mxu1 }
 0x107   :  { %v1081_v9 = vpack.c.bf16 %v374_v3, %v372_v47  ;;  %v1121_v14 = vpack.c.bf16 %v1555_v5, %v1537_v48  ;;  %v712_v56 = vmul.f32 %v374_v3, %v374_v3  ;;  %v642_v40 = vadd.f32 %v641_v58, %v374_v3 }
 0x108   :  { %v715_v3 = vmul.f32 %v1391_v37, %v1391_v37  ;;  %v728_v27 = vmul.f32 %v1555_v5, %v1555_v5 }
 0x109   :  { %1213 = vst [vmem:[%s1792_s2 + $0x30] sm:$0xff] %v1081_v9   ;;  %v775_v61 = vadd.f32 %v774_v33, %v712_v56 }
 0x10a   :  { %1221 = vst [vmem:[%s1792_s2 + $0x70] sm:$0xff] %v1121_v14  }
 0x10d   :  { %v1611_v56 = vpop.f32.mrf.mxu2 }
 0x10e   :  { %v377_v43 = vpop.f32.mrf.mxu0  ;;  %v1569_v44 = vpop.f32.mrf.mxu1 }
 0x10f   :  { %v713_v59 = vmul.f32 %v377_v43, %v377_v43  ;;  %v643_v62 = vadd.f32 %v642_v40, %v377_v43 }
 0x111   :  { %v776_v1 = vadd.f32 %v775_v61, %v713_v59  ;;  %v721_v61 = vmul.f32 %v1454_v12, %v1454_v12 }
 0x116   :  { %v379_v8 = vpop.f32.mrf.mxu0  ;;  %v1585_v9 = vpop.f32.mrf.mxu1 }
 0x117   :  { %v1086_v14 = vpack.c.bf16 %v379_v8, %v377_v43  ;;  %v644_v6 = vadd.f32 %v643_v62, %v379_v8  ;;  %v714_v47 = vmul.f32 %v379_v8, %v379_v8  ;;  %v1126_v18 = vpack.c.bf16 %v1585_v9, %v1569_v44 }
 0x119   :  { %1214 = vst [vmem:[%s1792_s2 + $0x38] sm:$0xff] %v1086_v14   ;;  %v645_v11 = vadd.f32 %v644_v6, %v1391_v37  ;;  %v777_v15 = vadd.f32 %v776_v1, %v714_v47  ;;  %v718_v37 = vmul.f32 %v1414_v55, %v1414_v55  ;;  %v722_v1 = vmul.f32 %v1463_v16, %v1463_v16  ;;  %v1637_v6 = vpop.f32.mrf.mxu2 }
 0x11a   :  { %1222 = vst [vmem:[%s1792_s2 + $0x78] sm:$0xff] %v1126_v18   ;;  %v723_v47 = vmul.f32 %v1477_v22, %v1477_v22 }
 0x11b   :  { %v646_v29 = vadd.f32 %v645_v11, %v1399_v42  ;;  %v778_v30 = vadd.f32 %v777_v15, %v715_v3  ;;  %v1161_v42 = vpack.c.bf16 %v1611_v56, %v1589_v25  ;;  %v724_v11 = vmul.f32 %v1493_v28, %v1493_v28 }
 0x11d   :  { %v647_v39 = vadd.f32 %v646_v29, %v1409_v49  ;;  %v779_v43 = vadd.f32 %v778_v30, %v716_v26  ;;  %v719_v49 = vmul.f32 %v1426_v63, %v1426_v63  ;;  %1229 = vst [vmem:[%s1792_s2 + $0xb0] sm:$0xff] %v1161_v42   ;;  %v726_v30 = vmul.f32 %v1523_v41, %v1523_v41 }
 0x11f   :  { %v648_v21 = vadd.f32 %v647_v39, %v1414_v55  ;;  %v780_v54 = vadd.f32 %v779_v43, %v717_v38  ;;  %v720_v55 = vmul.f32 %v1442_v7, %v1442_v7 }
 0x121   :  { %v649_v58 = vadd.f32 %v648_v21, %v1426_v63  ;;  %v781_v33 = vadd.f32 %v780_v54, %v718_v37 }
 0x123   :  { %v650_v59 = vadd.f32 %v649_v58, %v1442_v7  ;;  %v782_v40 = vadd.f32 %v781_v33, %v719_v49  ;;  %v1639_v7 = vpop.f32.mrf.mxu3 }
 0x125   :  { %v783_v62 = vadd.f32 %v782_v40, %v720_v55  ;;  %v651_v63 = vadd.f32 %v650_v59, %v1454_v12  ;;  %v730_v59 = vmul.f32 %v1585_v9, %v1585_v9 }
 0x127   :  { %v652_v8 = vadd.f32 %v651_v63, %v1463_v16  ;;  %v784_v14 = vadd.f32 %v783_v62, %v721_v61  ;;  %v725_v16 = vmul.f32 %v1507_v34, %v1507_v34  ;;  %v732_v63 = vmul.f32 %v1430_v2, %v1430_v2 }
 0x129   :  { %v653_v18 = vadd.f32 %v652_v8, %v1477_v22  ;;  %v785_v3 = vadd.f32 %v784_v14, %v722_v1  ;;  %v1653_v22 = vpop.f32.mrf.mxu2  ;;  %v733_v8 = vmul.f32 %v1446_v10, %v1446_v10 }
 0x12b   :  { %v654_v12 = vadd.f32 %v653_v18, %v1493_v28  ;;  %v786_v15 = vadd.f32 %v785_v3, %v723_v47  ;;  %v1655_v43 = vpop.f32.mrf.mxu3  ;;  %v1166_v28 = vpack.c.bf16 %v1653_v22, %v1637_v6  ;;  %v734_v47 = vmul.f32 %v1456_v13, %v1456_v13 }
 0x12c   :  { %v1196_v37 = vpack.c.bf16 %v1655_v43, %v1639_v7 }
 0x12d   :  { %v655_v26 = vadd.f32 %v654_v12, %v1507_v34  ;;  %v787_v29 = vadd.f32 %v786_v15, %v724_v11  ;;  %v727_v34 = vmul.f32 %v1537_v48, %v1537_v48  ;;  %1230 = vst [vmem:[%s1792_s2 + $0xb8] sm:$0xff] %v1166_v28  }
 0x12e   :  { %1236 = vst [vmem:[%s1792_s2 + $0xe8] sm:$0xff] %v1196_v37   ;;  %v739_v37 = vmul.f32 %v1527_v45, %v1527_v45 }
 0x12f   :  { %v656_v38 = vadd.f32 %v655_v26, %v1523_v41  ;;  %v788_v39 = vadd.f32 %v787_v29, %v725_v16  ;;  %v737_v26 = vmul.f32 %v1497_v31, %v1497_v31 }
 0x131   :  { %v657_v21 = vadd.f32 %v656_v38, %v1537_v48  ;;  %v789_v54 = vadd.f32 %v788_v39, %v726_v30  ;;  %v729_v48 = vmul.f32 %v1569_v44, %v1569_v44 }
 0x133   :  { %v790_v41 = vadd.f32 %v789_v54, %v727_v34  ;;  %v658_v42 = vadd.f32 %v657_v21, %v1555_v5  ;;  %v1679_v40 = vpop.f32.mrf.mxu3  ;;  %v731_v5 = vmul.f32 %v1418_v60, %v1418_v60  ;;  %v740_v34 = vmul.f32 %v1539_v50, %v1539_v50 }
 0x135   :  { %v791_v49 = vadd.f32 %v790_v41, %v728_v27  ;;  %v659_v58 = vadd.f32 %v658_v42, %v1569_v44  ;;  %v741_v41 = vmul.f32 %v1559_v17, %v1559_v17 }
 0x137   :  { %v792_v33 = vadd.f32 %v791_v49, %v729_v48  ;;  %v660_v55 = vadd.f32 %v659_v58, %v1585_v9  ;;  %v742_v49 = vmul.f32 %v1571_v52, %v1571_v52 }
 0x139   :  { %v661_v61 = vadd.f32 %v660_v55, %v1418_v60  ;;  %v793_v62 = vadd.f32 %v792_v33, %v730_v59 }
 0x13b   :  { %v662_v1 = vadd.f32 %v661_v61, %v1430_v2  ;;  %v794_v44 = vadd.f32 %v793_v62, %v731_v5  ;;  %v1693_v60 = vpop.f32.mrf.mxu3  ;;  %v735_v2 = vmul.f32 %v1467_v19, %v1467_v19  ;;  %v745_v62 = vmul.f32 %v1637_v6, %v1637_v6 }
 0x13c   :  { %v1201_v11 = vpack.c.bf16 %v1693_v60, %v1679_v40 }
 0x13d   :  { %v663_v14 = vadd.f32 %v662_v1, %v1446_v10  ;;  %v795_v9 = vadd.f32 %v794_v44, %v732_v63  ;;  %v736_v10 = vmul.f32 %v1479_v23, %v1479_v23  ;;  %v747_v44 = vmul.f32 %v1469_v20, %v1469_v20 }
 0x13e   :  { %1237 = vst [vmem:[%s1792_s2 + $0xf0] sm:$0xff] %v1201_v11  }
 0x13f   :  { %v664_v18 = vadd.f32 %v663_v14, %v1456_v13  ;;  %v796_v3 = vadd.f32 %v795_v9, %v733_v8 }
 0x141   :  { %v665_v12 = vadd.f32 %v664_v18, %v1467_v19  ;;  %v797_v15 = vadd.f32 %v796_v3, %v734_v47  ;;  %v738_v19 = vmul.f32 %v1509_v35, %v1509_v35 }
 0x143   :  { %v666_v13 = vadd.f32 %v665_v12, %v1479_v23  ;;  %v798_v16 = vadd.f32 %v797_v15, %v735_v2  ;;  %v1712_v28 = vpop.f32.mrf.mxu3 }
 0x145   :  { %v799_v29 = vadd.f32 %v798_v16, %v736_v10  ;;  %v667_v30 = vadd.f32 %v666_v13, %v1497_v31 }
 0x147   :  { %v668_v38 = vadd.f32 %v667_v30, %v1509_v35  ;;  %v800_v39 = vadd.f32 %v799_v29, %v737_v26 }
 0x149   :  { %v669_v23 = vadd.f32 %v668_v38, %v1527_v45  ;;  %v801_v21 = vadd.f32 %v800_v39, %v738_v19 }
 0x14b   :  { %v670_v54 = vadd.f32 %v669_v23, %v1539_v50  ;;  %v802_v31 = vadd.f32 %v801_v21, %v739_v37  ;;  %v499_v45 = vpop.f32.mrf.mxu3  ;;  %v743_v50 = vmul.f32 %v1589_v25, %v1589_v25 }
 0x14c   :  { %v1206_v48 = vpack.c.bf16 %v499_v45, %v1712_v28 }
 0x14d   :  { %v671_v35 = vadd.f32 %v670_v54, %v1559_v17  ;;  %v803_v42 = vadd.f32 %v802_v31, %v740_v34  ;;  %v758_v34 = vmul.f32 %v1655_v43, %v1655_v43 }
 0x14e   :  { %1238 = vst [vmem:[%s1792_s2 + $0xf8] sm:$0xff] %v1206_v48   ;;  %v762_v48 = vmul.f32 %v499_v45, %v499_v45 }
 0x14f   :  { %v672_v27 = vadd.f32 %v671_v35, %v1571_v52  ;;  %v804_v58 = vadd.f32 %v803_v42, %v741_v41  ;;  %v744_v52 = vmul.f32 %v1611_v56, %v1611_v56  ;;  %v759_v41 = vmul.f32 %v1679_v40, %v1679_v40 }
 0x150   :  { %v760_v42 = vmul.f32 %v1693_v60, %v1693_v60 }
 0x151   :  { %v805_v33 = vadd.f32 %v804_v58, %v742_v49  ;;  %v673_v55 = vadd.f32 %v672_v27, %v1589_v25  ;;  %v746_v25 = vmul.f32 %v1653_v22, %v1653_v22  ;;  %v761_v49 = vmul.f32 %v1712_v28, %v1712_v28 }
 0x153   :  { %v806_v17 = vadd.f32 %v805_v33, %v743_v50  ;;  %v674_v59 = vadd.f32 %v673_v55, %v1611_v56  ;;  %v748_v56 = vmul.f32 %v1481_v24, %v1481_v24 }
 0x155   :  { %v807_v5 = vadd.f32 %v806_v17, %v744_v52  ;;  %v675_v61 = vadd.f32 %v674_v59, %v1637_v6  ;;  %v749_v6 = vmul.f32 %v1499_v32, %v1499_v32 }
 0x157   :  { %v808_v63 = vadd.f32 %v807_v5, %v745_v62  ;;  %v676_v1 = vadd.f32 %v675_v61, %v1653_v22  ;;  %v750_v22 = vmul.f32 %v1511_v36, %v1511_v36 }
 0x159   :  { %v677_v8 = vadd.f32 %v676_v1, %v1469_v20  ;;  %v809_v14 = vadd.f32 %v808_v63, %v746_v25  ;;  %v751_v20 = vmul.f32 %v1529_v46, %v1529_v46 }
 0x15b   :  { %v678_v9 = vadd.f32 %v677_v8, %v1481_v24  ;;  %v810_v47 = vadd.f32 %v809_v14, %v747_v44  ;;  %v752_v24 = vmul.f32 %v1541_v51, %v1541_v51 }
 0x15d   :  { %v679_v18 = vadd.f32 %v678_v9, %v1499_v32  ;;  %v811_v3 = vadd.f32 %v810_v47, %v748_v56  ;;  %v753_v32 = vmul.f32 %v1561_v0, %v1561_v0 }
 0x15f   :  { %v680_v11 = vadd.f32 %v679_v18, %v1511_v36  ;;  %v812_v2 = vadd.f32 %v811_v3, %v749_v6  ;;  %v754_v36 = vmul.f32 %v1573_v53, %v1573_v53 }
 0x161   :  { %v681_v12 = vadd.f32 %v680_v11, %v1529_v46  ;;  %v813_v15 = vadd.f32 %v812_v2, %v750_v22  ;;  %v755_v46 = vmul.f32 %v1591_v4, %v1591_v4 }
 0x163   :  { %v682_v10 = vadd.f32 %v681_v12, %v1541_v51  ;;  %v814_v13 = vadd.f32 %v813_v15, %v751_v20  ;;  %v756_v51 = vmul.f32 %v1613_v57, %v1613_v57 }
 0x165   :  { %v815_v16 = vadd.f32 %v814_v13, %v752_v24  ;;  %v683_v26 = vadd.f32 %v682_v10, %v1561_v0  ;;  %v757_v0 = vmul.f32 %v1639_v7, %v1639_v7 }
 0x167   :  { %v684_v29 = vadd.f32 %v683_v26, %v1573_v53  ;;  %v816_v30 = vadd.f32 %v815_v16, %v753_v32 }
 0x169   :  { %v685_v19 = vadd.f32 %v684_v29, %v1591_v4  ;;  %v817_v38 = vadd.f32 %v816_v30, %v754_v36 }
 0x16b   :  { %v686_v39 = vadd.f32 %v685_v19, %v1613_v57  ;;  %v818_v37 = vadd.f32 %v817_v38, %v755_v46 }
 0x16d   :  { %v687_v23 = vadd.f32 %v686_v39, %v1639_v7  ;;  %v819_v21 = vadd.f32 %v818_v37, %v756_v51 }
 0x16f   :  { %v688_v53 = vadd.f32 %v687_v23, %v1655_v43  ;;  %v820_v54 = vadd.f32 %v819_v21, %v757_v0 }
 0x171   :  { %v821_v4 = vadd.f32 %v820_v54, %v758_v34  ;;  %v689_v31 = vadd.f32 %v688_v53, %v1679_v40  ;;  %v832_v40 = vlaneseq }
 0x173   :  { %v822_v57 = vadd.f32 %v821_v4, %v759_v41  ;;  %v690_v35 = vadd.f32 %v689_v31, %v1693_v60  ;;  %v833_v62 = vshrl.u32 %v832_v40, 7 }
 0x175   :  { %v823_v7 = vadd.f32 %v822_v57, %v760_v42  ;;  %v691_v27 = vadd.f32 %v690_v35, %v1712_v28  ;;  %vm834_vm0 = vcmp.eq.s32.totalorder %v833_v62, 0  ;;  %vm836_vm1 = vcmp.eq.s32.totalorder %v833_v62, 1 }
 0x177   :  { %v824_v43 = vadd.f32 %v823_v7, %v761_v49  ;;  %v692_v58 = vadd.f32 %v691_v27, %v499_v45 }
 0x179   :  { %v693_v33 = vrot.slane %v692_v58, 4  ;;  %v825_v55 = vadd.f32 %v824_v43, %v762_v48 }
 0x17b   :  { %v694_v50 = vadd.f32 %v693_v33, %v692_v58  ;;  %v826_v17 = vrot.slane %v825_v55, 4 }
 0x17d   :  { %v695_v59 = vrot.slane %v694_v50, 2  ;;  %v827_v52 = vadd.f32 %v826_v17, %v825_v55 }
 0x17f   :  { %v696_v5 = vadd.f32 %v695_v59, %v694_v50  ;;  %v828_v61 = vrot.slane %v827_v52, 2 }
 0x181   :  { %v697_v60 = vrot.slane %v696_v5, 1  ;;  %v829_v63 = vadd.f32 %v828_v61, %v827_v52 }
 0x183   :  { %v698_v1 = vadd.f32 %v697_v60, %v696_v5  ;;  %v830_v25 = vrot.slane %v829_v63, 1 }
 0x185   :  { %v831_v28 = vadd.f32 %v830_v25, %v829_v63  ;;  %v835_v44 = vsel %vm834_vm0, %v698_v1, 0.0 }
 0x187   :  { %v837_v8 = vsel %vm836_vm1, %v831_v28, 0.0 }
 0x188   :  { %v838_v45 = vadd.f32 %v837_v8, %v835_v44 }
 0x18a   :  { %839 = vst [vmem:[%s1793_s3] sm:$0xff] %v838_v45 }

// kernel: resblock_forward.3
= control target key start
LH: loop header
LB: loop body
LE: loop exit
PB: predicated region body
PF: predicated region fallthrough
CT: control target
= control target key end

     0   :  { %s1345_s0 = inlined_call_operand.vmem [shape: bf16[512,128], index: 0, kind: input, shape index: {}]   ;;  %s1346_s2 = inlined_call_operand.vmem [shape: f32[1,128], index: 2, kind: input, shape index: {}]   ;;  %s1347_s3 = inlined_call_operand.vmem [shape: f32[1,128], index: 3, kind: input, shape index: {}]   ;;  %s1348_s1 = inlined_call_operand.vmem [shape: f32[512,128], index: 1, kind: input, shape index: {}]   ;;  %s1349_s4 = inlined_call_operand.vmem [shape: f32[512,128], index: 4, kind: output, shape index: {}]  }
   0x1   :  { %v542_v0 = vld [vmem:[%s1345_s0] sm:$0xff]   ;;  %v669_v5 = vld [vmem:[%s1345_s0 + $0x8] sm:$0xff]   ;;  %v670_v10 = vld [vmem:[%s1345_s0 + $0x10] sm:$0xff]  }
   0x2   :  { %v733_v1 = vld [vmem:[%s1346_s2] ss:$0 sm:$0xff]  ;;  %v543_v2 = vunpack.c.l.bf16 %v542_v0  ;;  %v544_v4 = vunpack.c.h.bf16 %v542_v0  ;;  %v547_v8 = vunpack.c.l.bf16 %v669_v5  ;;  %v548_v9 = vunpack.c.h.bf16 %v669_v5  ;;  %v671_v13 = vld [vmem:[%s1345_s0 + $0x18] sm:$0xff]   ;;  %v346_v19 = vld [vmem:[%s1348_s1 + $0x8] sm:$0xff] }
   0x3   :  { %v738_v3 = vld [vmem:[%s1347_s3] ss:$0 sm:$0xff]  ;;  %v551_v11 = vunpack.c.l.bf16 %v670_v10  ;;  %v552_v12 = vunpack.c.h.bf16 %v670_v10  ;;  %v555_v22 = vunpack.c.l.bf16 %v671_v13  ;;  %v556_v23 = vunpack.c.h.bf16 %v671_v13  ;;  %v347_v28 = vld [vmem:[%s1348_s1 + $0x10] sm:$0xff]  ;;  %v348_v29 = vld [vmem:[%s1348_s1 + $0x18] sm:$0xff] }
   0x4   :  { %v149_v6 = vmul.f32 %v733_v1, %v543_v2  ;;  %v150_v7 = vmul.f32 %v733_v1, %v544_v4  ;;  %v151_v16 = vmul.f32 %v733_v1, %v547_v8  ;;  %v152_v17 = vmul.f32 %v733_v1, %v548_v9  ;;  %v345_v18 = vld [vmem:[%s1348_s1] sm:$0xff]  ;;  %v350_v40 = vld [vmem:[%s1348_s1 + $0x28] sm:$0xff]  ;;  %v351_v48 = vld [vmem:[%s1348_s1 + $0x30] sm:$0xff] }
   0x5   :  { %v153_v20 = vmul.f32 %v733_v1, %v551_v11  ;;  %v154_v21 = vmul.f32 %v733_v1, %v552_v12  ;;  %v155_v32 = vmul.f32 %v733_v1, %v555_v22  ;;  %v156_v33 = vmul.f32 %v733_v1, %v556_v23  ;;  %v672_v34 = vld [vmem:[%s1345_s0 + $0x20] sm:$0xff]   ;;  %v673_v45 = vld [vmem:[%s1345_s0 + $0x28] sm:$0xff]   ;;  %v352_v49 = vld [vmem:[%s1348_s1 + $0x38] sm:$0xff] }
   0x6   :  { %v217_v14 = vadd.f32 %v738_v3, %v149_v6  ;;  %v218_v15 = vadd.f32 %v738_v3, %v150_v7  ;;  %v219_v26 = vadd.f32 %v738_v3, %v151_v16  ;;  %v220_v27 = vadd.f32 %v738_v3, %v152_v17  ;;  %v349_v39 = vld [vmem:[%s1348_s1 + $0x20] sm:$0xff]  ;;  %v674_v52 = vld [vmem:[%s1345_s0 + $0x30] sm:$0xff]   ;;  %v675_v61 = vld [vmem:[%s1345_s0 + $0x38] sm:$0xff]  }
   0x7   :  { %v221_v30 = vadd.f32 %v738_v3, %v153_v20  ;;  %v222_v31 = vadd.f32 %v738_v3, %v154_v21  ;;  %v223_v43 = vadd.f32 %v738_v3, %v155_v32  ;;  %v224_v44 = vadd.f32 %v738_v3, %v156_v33  ;;  %v353_v8 = vld [vmem:[%s1348_s1 + $0x40] sm:$0xff]  ;;  %v354_v9 = vld [vmem:[%s1348_s1 + $0x48] sm:$0xff] }
   0x8   :  { %v281_v24 = vmax.f32 %v217_v14, 0.0  ;;  %v282_v25 = vmax.f32 %v218_v15, 0.0  ;;  %v283_v37 = vmax.f32 %v219_v26, 0.0  ;;  %v284_v38 = vmax.f32 %v220_v27, 0.0 }
   0x9   :  { %v285_v41 = vmax.f32 %v221_v30, 0.0  ;;  %v286_v42 = vmax.f32 %v222_v31, 0.0  ;;  %v559_v50 = vunpack.c.l.bf16 %v672_v34  ;;  %v560_v51 = vunpack.c.h.bf16 %v672_v34  ;;  %v358_v30 = vld [vmem:[%s1348_s1 + $0x68] sm:$0xff] }
   0xa   :  { %v409_v35 = vadd.f32 %v345_v18, %v281_v24  ;;  %v410_v36 = vadd.f32 %v346_v19, %v282_v25  ;;  %v411_v46 = vadd.f32 %v347_v28, %v283_v37  ;;  %v412_v47 = vadd.f32 %v348_v29, %v284_v38  ;;  %v355_v18 = vld [vmem:[%s1348_s1 + $0x50] sm:$0xff]  ;;  %v356_v19 = vld [vmem:[%s1348_s1 + $0x58] sm:$0xff]  ;;  %v676_v24 = vld [vmem:[%s1345_s0 + $0x40] sm:$0xff]  }
   0xb   :  { %v413_v53 = vadd.f32 %v349_v39, %v285_v41  ;;  %v414_v54 = vadd.f32 %v350_v40, %v286_v42  ;;  %v287_v55 = vmax.f32 %v223_v43, 0.0  ;;  %v288_v56 = vmax.f32 %v224_v44, 0.0  ;;  %v357_v29 = vld [vmem:[%s1348_s1 + $0x60] sm:$0xff]  ;;  %v359_v38 = vld [vmem:[%s1348_s1 + $0x70] sm:$0xff]  ;;  %v360_v39 = vld [vmem:[%s1348_s1 + $0x78] sm:$0xff] }
   0xc   :  { %473 = vst [vmem:[%s1349_s4] sm:$0xff] %v409_v35  ;;  %v157_v57 = vmul.f32 %v733_v1, %v559_v50  ;;  %v158_v58 = vmul.f32 %v733_v1, %v560_v51  ;;  %v563_v59 = vunpack.c.l.bf16 %v673_v45  ;;  %v564_v60 = vunpack.c.h.bf16 %v673_v45  ;;  %v677_v35 = vld [vmem:[%s1345_s0 + $0x48] sm:$0xff]   ;;  %v678_v42 = vld [vmem:[%s1345_s0 + $0x50] sm:$0xff]   ;;  %v679_v51 = vld [vmem:[%s1345_s0 + $0x58] sm:$0xff]  }
   0xd   :  { %474 = vst [vmem:[%s1349_s4 + $0x8] sm:$0xff] %v410_v36  ;;  %v415_v62 = vadd.f32 %v351_v48, %v287_v55  ;;  %v416_v63 = vadd.f32 %v352_v49, %v288_v56  ;;  %v567_v0 = vunpack.c.l.bf16 %v674_v52  ;;  %v568_v2 = vunpack.c.h.bf16 %v674_v52 }
   0xe   :  { %475 = vst [vmem:[%s1349_s4 + $0x10] sm:$0xff] %v411_v46  ;;  %v225_v4 = vadd.f32 %v738_v3, %v157_v57  ;;  %v226_v5 = vadd.f32 %v738_v3, %v158_v58  ;;  %v159_v6 = vmul.f32 %v733_v1, %v563_v59  ;;  %v160_v7 = vmul.f32 %v733_v1, %v564_v60  ;;  %v361_v60 = vld [vmem:[%s1348_s1 + $0x80] sm:$0xff] }
   0xf   :  { %476 = vst [vmem:[%s1349_s4 + $0x18] sm:$0xff] %v412_v47  ;;  %v161_v10 = vmul.f32 %v733_v1, %v567_v0  ;;  %v162_v11 = vmul.f32 %v733_v1, %v568_v2  ;;  %v571_v12 = vunpack.c.l.bf16 %v675_v61  ;;  %v572_v13 = vunpack.c.h.bf16 %v675_v61  ;;  %v362_v61 = vld [vmem:[%s1348_s1 + $0x88] sm:$0xff] }
  0x10   :  { %477 = vst [vmem:[%s1349_s4 + $0x20] sm:$0xff] %v413_v53  ;;  %v289_v14 = vmax.f32 %v225_v4, 0.0  ;;  %v290_v15 = vmax.f32 %v226_v5, 0.0  ;;  %v227_v16 = vadd.f32 %v738_v3, %v159_v6  ;;  %v228_v17 = vadd.f32 %v738_v3, %v160_v7 }
  0x11   :  { %478 = vst [vmem:[%s1349_s4 + $0x28] sm:$0xff] %v414_v54  ;;  %v229_v20 = vadd.f32 %v738_v3, %v161_v10  ;;  %v230_v21 = vadd.f32 %v738_v3, %v162_v11  ;;  %v163_v22 = vmul.f32 %v733_v1, %v571_v12  ;;  %v164_v23 = vmul.f32 %v733_v1, %v572_v13 }
  0x12   :  { %479 = vst [vmem:[%s1349_s4 + $0x30] sm:$0xff] %v415_v62  ;;  %v417_v25 = vadd.f32 %v353_v8, %v289_v14  ;;  %v418_v26 = vadd.f32 %v354_v9, %v290_v15  ;;  %v291_v27 = vmax.f32 %v227_v16, 0.0  ;;  %v292_v28 = vmax.f32 %v228_v17, 0.0  ;;  %v363_v8 = vld [vmem:[%s1348_s1 + $0x90] sm:$0xff]  ;;  %v364_v9 = vld [vmem:[%s1348_s1 + $0x98] sm:$0xff]  ;;  %v680_v14 = vld [vmem:[%s1345_s0 + $0x60] sm:$0xff]  }
  0x13   :  { %480 = vst [vmem:[%s1349_s4 + $0x38] sm:$0xff] %v416_v63  ;;  %v293_v31 = vmax.f32 %v229_v20, 0.0  ;;  %v294_v32 = vmax.f32 %v230_v21, 0.0  ;;  %v231_v33 = vadd.f32 %v738_v3, %v163_v22  ;;  %v232_v34 = vadd.f32 %v738_v3, %v164_v23  ;;  %v366_v20 = vld [vmem:[%s1348_s1 + $0xa8] sm:$0xff] }
  0x14   :  { %481 = vst [vmem:[%s1349_s4 + $0x40] sm:$0xff] %v417_v25  ;;  %v419_v36 = vadd.f32 %v355_v18, %v291_v27  ;;  %v420_v37 = vadd.f32 %v356_v19, %v292_v28  ;;  %v575_v40 = vunpack.c.l.bf16 %v676_v24  ;;  %v576_v41 = vunpack.c.h.bf16 %v676_v24  ;;  %v365_v19 = vld [vmem:[%s1348_s1 + $0xa0] sm:$0xff]  ;;  %v681_v25 = vld [vmem:[%s1345_s0 + $0x68] sm:$0xff]   ;;  %v367_v28 = vld [vmem:[%s1348_s1 + $0xb0] sm:$0xff] }
  0x15   :  { %482 = vst [vmem:[%s1349_s4 + $0x48] sm:$0xff] %v418_v26  ;;  %v421_v43 = vadd.f32 %v357_v29, %v293_v31  ;;  %v422_v44 = vadd.f32 %v358_v30, %v294_v32  ;;  %v295_v45 = vmax.f32 %v231_v33, 0.0  ;;  %v296_v46 = vmax.f32 %v232_v34, 0.0  ;;  %v368_v29 = vld [vmem:[%s1348_s1 + $0xb8] sm:$0xff]  ;;  %v682_v32 = vld [vmem:[%s1345_s0 + $0x70] sm:$0xff]  }
  0x16   :  { %483 = vst [vmem:[%s1349_s4 + $0x50] sm:$0xff] %v419_v36  ;;  %v165_v47 = vmul.f32 %v733_v1, %v575_v40  ;;  %v166_v48 = vmul.f32 %v733_v1, %v576_v41  ;;  %v579_v49 = vunpack.c.l.bf16 %v677_v35  ;;  %v580_v50 = vunpack.c.h.bf16 %v677_v35  ;;  %v683_v41 = vld [vmem:[%s1345_s0 + $0x78] sm:$0xff]  }
  0x17   :  { %484 = vst [vmem:[%s1349_s4 + $0x58] sm:$0xff] %v420_v37  ;;  %v423_v52 = vadd.f32 %v359_v38, %v295_v45  ;;  %v424_v53 = vadd.f32 %v360_v39, %v296_v46  ;;  %v583_v54 = vunpack.c.l.bf16 %v678_v42  ;;  %v584_v55 = vunpack.c.h.bf16 %v678_v42 }
  0x18   :  { %485 = vst [vmem:[%s1349_s4 + $0x60] sm:$0xff] %v421_v43  ;;  %v233_v56 = vadd.f32 %v738_v3, %v165_v47  ;;  %v234_v57 = vadd.f32 %v738_v3, %v166_v48  ;;  %v167_v58 = vmul.f32 %v733_v1, %v579_v49  ;;  %v168_v59 = vmul.f32 %v733_v1, %v580_v50  ;;  %v369_v50 = vld [vmem:[%s1348_s1 + $0xc0] sm:$0xff] }
  0x19   :  { %486 = vst [vmem:[%s1349_s4 + $0x68] sm:$0xff] %v422_v44  ;;  %v169_v62 = vmul.f32 %v733_v1, %v583_v54  ;;  %v170_v63 = vmul.f32 %v733_v1, %v584_v55  ;;  %v587_v0 = vunpack.c.l.bf16 %v679_v51  ;;  %v588_v2 = vunpack.c.h.bf16 %v679_v51  ;;  %v370_v51 = vld [vmem:[%s1348_s1 + $0xc8] sm:$0xff] }
  0x1a   :  { %487 = vst [vmem:[%s1349_s4 + $0x70] sm:$0xff] %v423_v52  ;;  %v297_v4 = vmax.f32 %v233_v56, 0.0  ;;  %v298_v5 = vmax.f32 %v234_v57, 0.0  ;;  %v235_v6 = vadd.f32 %v738_v3, %v167_v58  ;;  %v236_v7 = vadd.f32 %v738_v3, %v168_v59 }
  0x1b   :  { %488 = vst [vmem:[%s1349_s4 + $0x78] sm:$0xff] %v424_v53  ;;  %v237_v10 = vadd.f32 %v738_v3, %v169_v62  ;;  %v238_v11 = vadd.f32 %v738_v3, %v170_v63  ;;  %v171_v12 = vmul.f32 %v733_v1, %v587_v0  ;;  %v172_v13 = vmul.f32 %v733_v1, %v588_v2 }
  0x1c   :  { %v425_v15 = vadd.f32 %v361_v60, %v297_v4  ;;  %v426_v16 = vadd.f32 %v362_v61, %v298_v5  ;;  %v299_v17 = vmax.f32 %v235_v6, 0.0  ;;  %v300_v18 = vmax.f32 %v236_v7, 0.0  ;;  %v371_v60 = vld [vmem:[%s1348_s1 + $0xd0] sm:$0xff]  ;;  %v372_v61 = vld [vmem:[%s1348_s1 + $0xd8] sm:$0xff]  ;;  %v684_v4 = vld [vmem:[%s1345_s0 + $0x80] sm:$0xff]  }
  0x1d   :  { %v301_v21 = vmax.f32 %v237_v10, 0.0  ;;  %v302_v22 = vmax.f32 %v238_v11, 0.0  ;;  %v239_v23 = vadd.f32 %v738_v3, %v171_v12  ;;  %v240_v24 = vadd.f32 %v738_v3, %v172_v13  ;;  %v374_v10 = vld [vmem:[%s1348_s1 + $0xe8] sm:$0xff] }
  0x1e   :  { %489 = vst [vmem:[%s1349_s4 + $0x80] sm:$0xff] %v425_v15  ;;  %v427_v26 = vadd.f32 %v363_v8, %v299_v17  ;;  %v428_v27 = vadd.f32 %v364_v9, %v300_v18  ;;  %v591_v30 = vunpack.c.l.bf16 %v680_v14  ;;  %v592_v31 = vunpack.c.h.bf16 %v680_v14  ;;  %v373_v9 = vld [vmem:[%s1348_s1 + $0xe0] sm:$0xff]  ;;  %v685_v15 = vld [vmem:[%s1345_s0 + $0x88] sm:$0xff]   ;;  %v375_v18 = vld [vmem:[%s1348_s1 + $0xf0] sm:$0xff] }
  0x1f   :  { %490 = vst [vmem:[%s1349_s4 + $0x88] sm:$0xff] %v426_v16  ;;  %v429_v33 = vadd.f32 %v365_v19, %v301_v21  ;;  %v430_v34 = vadd.f32 %v366_v20, %v302_v22  ;;  %v303_v35 = vmax.f32 %v239_v23, 0.0  ;;  %v304_v36 = vmax.f32 %v240_v24, 0.0  ;;  %v376_v19 = vld [vmem:[%s1348_s1 + $0xf8] sm:$0xff]  ;;  %v686_v22 = vld [vmem:[%s1345_s0 + $0x90] sm:$0xff]  }
  0x20   :  { %491 = vst [vmem:[%s1349_s4 + $0x90] sm:$0xff] %v427_v26  ;;  %v173_v37 = vmul.f32 %v733_v1, %v591_v30  ;;  %v174_v38 = vmul.f32 %v733_v1, %v592_v31  ;;  %v595_v39 = vunpack.c.l.bf16 %v681_v25  ;;  %v596_v40 = vunpack.c.h.bf16 %v681_v25  ;;  %v687_v31 = vld [vmem:[%s1345_s0 + $0x98] sm:$0xff]  }
  0x21   :  { %492 = vst [vmem:[%s1349_s4 + $0x98] sm:$0xff] %v428_v27  ;;  %v431_v42 = vadd.f32 %v367_v28, %v303_v35  ;;  %v432_v43 = vadd.f32 %v368_v29, %v304_v36  ;;  %v599_v44 = vunpack.c.l.bf16 %v682_v32  ;;  %v600_v45 = vunpack.c.h.bf16 %v682_v32 }
  0x22   :  { %493 = vst [vmem:[%s1349_s4 + $0xa0] sm:$0xff] %v429_v33  ;;  %v241_v46 = vadd.f32 %v738_v3, %v173_v37  ;;  %v242_v47 = vadd.f32 %v738_v3, %v174_v38  ;;  %v175_v48 = vmul.f32 %v733_v1, %v595_v39  ;;  %v176_v49 = vmul.f32 %v733_v1, %v596_v40  ;;  %v377_v40 = vld [vmem:[%s1348_s1 + $0x100] sm:$0xff] }
  0x23   :  { %494 = vst [vmem:[%s1349_s4 + $0xa8] sm:$0xff] %v430_v34  ;;  %v177_v52 = vmul.f32 %v733_v1, %v599_v44  ;;  %v178_v53 = vmul.f32 %v733_v1, %v600_v45  ;;  %v603_v54 = vunpack.c.l.bf16 %v683_v41  ;;  %v604_v55 = vunpack.c.h.bf16 %v683_v41  ;;  %v378_v41 = vld [vmem:[%s1348_s1 + $0x108] sm:$0xff] }
  0x24   :  { %495 = vst [vmem:[%s1349_s4 + $0xb0] sm:$0xff] %v431_v42  ;;  %v305_v56 = vmax.f32 %v241_v46, 0.0  ;;  %v306_v57 = vmax.f32 %v242_v47, 0.0  ;;  %v243_v58 = vadd.f32 %v738_v3, %v175_v48  ;;  %v244_v59 = vadd.f32 %v738_v3, %v176_v49 }
  0x25   :  { %496 = vst [vmem:[%s1349_s4 + $0xb8] sm:$0xff] %v432_v43  ;;  %v245_v62 = vadd.f32 %v738_v3, %v177_v52  ;;  %v246_v63 = vadd.f32 %v738_v3, %v178_v53  ;;  %v179_v0 = vmul.f32 %v733_v1, %v603_v54  ;;  %v180_v2 = vmul.f32 %v733_v1, %v604_v55 }
  0x26   :  { %v433_v5 = vadd.f32 %v369_v50, %v305_v56  ;;  %v434_v6 = vadd.f32 %v370_v51, %v306_v57  ;;  %v307_v7 = vmax.f32 %v243_v58, 0.0  ;;  %v308_v8 = vmax.f32 %v244_v59, 0.0  ;;  %v379_v50 = vld [vmem:[%s1348_s1 + $0x110] sm:$0xff]  ;;  %v380_v51 = vld [vmem:[%s1348_s1 + $0x118] sm:$0xff]  ;;  %v688_v56 = vld [vmem:[%s1345_s0 + $0xa0] sm:$0xff]  }
  0x27   :  { %v309_v11 = vmax.f32 %v245_v62, 0.0  ;;  %v310_v12 = vmax.f32 %v246_v63, 0.0  ;;  %v247_v13 = vadd.f32 %v738_v3, %v179_v0  ;;  %v248_v14 = vadd.f32 %v738_v3, %v180_v2  ;;  %v382_v62 = vld [vmem:[%s1348_s1 + $0x128] sm:$0xff] }
  0x28   :  { %497 = vst [vmem:[%s1349_s4 + $0xc0] sm:$0xff] %v433_v5  ;;  %v435_v16 = vadd.f32 %v371_v60, %v307_v7  ;;  %v436_v17 = vadd.f32 %v372_v61, %v308_v8  ;;  %v607_v20 = vunpack.c.l.bf16 %v684_v4  ;;  %v608_v21 = vunpack.c.h.bf16 %v684_v4  ;;  %v381_v61 = vld [vmem:[%s1348_s1 + $0x120] sm:$0xff]  ;;  %v689_v5 = vld [vmem:[%s1345_s0 + $0xa8] sm:$0xff]   ;;  %v383_v8 = vld [vmem:[%s1348_s1 + $0x130] sm:$0xff] }
  0x29   :  { %498 = vst [vmem:[%s1349_s4 + $0xc8] sm:$0xff] %v434_v6  ;;  %v437_v23 = vadd.f32 %v373_v9, %v309_v11  ;;  %v438_v24 = vadd.f32 %v374_v10, %v310_v12  ;;  %v311_v25 = vmax.f32 %v247_v13, 0.0  ;;  %v312_v26 = vmax.f32 %v248_v14, 0.0  ;;  %v384_v9 = vld [vmem:[%s1348_s1 + $0x138] sm:$0xff]  ;;  %v690_v12 = vld [vmem:[%s1345_s0 + $0xb0] sm:$0xff]  }
  0x2a   :  { %499 = vst [vmem:[%s1349_s4 + $0xd0] sm:$0xff] %v435_v16  ;;  %v181_v27 = vmul.f32 %v733_v1, %v607_v20  ;;  %v182_v28 = vmul.f32 %v733_v1, %v608_v21  ;;  %v611_v29 = vunpack.c.l.bf16 %v685_v15  ;;  %v612_v30 = vunpack.c.h.bf16 %v685_v15  ;;  %v691_v21 = vld [vmem:[%s1345_s0 + $0xb8] sm:$0xff]  }
  0x2b   :  { %500 = vst [vmem:[%s1349_s4 + $0xd8] sm:$0xff] %v436_v17  ;;  %v439_v32 = vadd.f32 %v375_v18, %v311_v25  ;;  %v440_v33 = vadd.f32 %v376_v19, %v312_v26  ;;  %v615_v34 = vunpack.c.l.bf16 %v686_v22  ;;  %v616_v35 = vunpack.c.h.bf16 %v686_v22 }
  0x2c   :  { %501 = vst [vmem:[%s1349_s4 + $0xe0] sm:$0xff] %v437_v23  ;;  %v249_v36 = vadd.f32 %v738_v3, %v181_v27  ;;  %v250_v37 = vadd.f32 %v738_v3, %v182_v28  ;;  %v183_v38 = vmul.f32 %v733_v1, %v611_v29  ;;  %v184_v39 = vmul.f32 %v733_v1, %v612_v30  ;;  %v385_v30 = vld [vmem:[%s1348_s1 + $0x140] sm:$0xff] }
  0x2d   :  { %502 = vst [vmem:[%s1349_s4 + $0xe8] sm:$0xff] %v438_v24  ;;  %v185_v42 = vmul.f32 %v733_v1, %v615_v34  ;;  %v186_v43 = vmul.f32 %v733_v1, %v616_v35  ;;  %v619_v44 = vunpack.c.l.bf16 %v687_v31  ;;  %v620_v45 = vunpack.c.h.bf16 %v687_v31  ;;  %v386_v31 = vld [vmem:[%s1348_s1 + $0x148] sm:$0xff] }
  0x2e   :  { %503 = vst [vmem:[%s1349_s4 + $0xf0] sm:$0xff] %v439_v32  ;;  %v313_v46 = vmax.f32 %v249_v36, 0.0  ;;  %v314_v47 = vmax.f32 %v250_v37, 0.0  ;;  %v251_v48 = vadd.f32 %v738_v3, %v183_v38  ;;  %v252_v49 = vadd.f32 %v738_v3, %v184_v39 }
  0x2f   :  { %504 = vst [vmem:[%s1349_s4 + $0xf8] sm:$0xff] %v440_v33  ;;  %v253_v52 = vadd.f32 %v738_v3, %v185_v42  ;;  %v254_v53 = vadd.f32 %v738_v3, %v186_v43  ;;  %v187_v54 = vmul.f32 %v733_v1, %v619_v44  ;;  %v188_v55 = vmul.f32 %v733_v1, %v620_v45 }
  0x30   :  { %v441_v57 = vadd.f32 %v377_v40, %v313_v46  ;;  %v442_v58 = vadd.f32 %v378_v41, %v314_v47  ;;  %v315_v59 = vmax.f32 %v251_v48, 0.0  ;;  %v316_v60 = vmax.f32 %v252_v49, 0.0  ;;  %v387_v40 = vld [vmem:[%s1348_s1 + $0x150] sm:$0xff]  ;;  %v388_v41 = vld [vmem:[%s1348_s1 + $0x158] sm:$0xff]  ;;  %v692_v46 = vld [vmem:[%s1345_s0 + $0xc0] sm:$0xff]  }
  0x31   :  { %v317_v63 = vmax.f32 %v253_v52, 0.0  ;;  %v318_v0 = vmax.f32 %v254_v53, 0.0  ;;  %v255_v2 = vadd.f32 %v738_v3, %v187_v54  ;;  %v256_v4 = vadd.f32 %v738_v3, %v188_v55  ;;  %v390_v52 = vld [vmem:[%s1348_s1 + $0x168] sm:$0xff] }
  0x32   :  { %505 = vst [vmem:[%s1349_s4 + $0x100] sm:$0xff] %v441_v57  ;;  %v443_v6 = vadd.f32 %v379_v50, %v315_v59  ;;  %v444_v7 = vadd.f32 %v380_v51, %v316_v60  ;;  %v623_v10 = vunpack.c.l.bf16 %v688_v56  ;;  %v624_v11 = vunpack.c.h.bf16 %v688_v56  ;;  %v389_v51 = vld [vmem:[%s1348_s1 + $0x160] sm:$0xff]  ;;  %v693_v57 = vld [vmem:[%s1345_s0 + $0xc8] sm:$0xff]   ;;  %v391_v60 = vld [vmem:[%s1348_s1 + $0x170] sm:$0xff] }
  0x33   :  { %506 = vst [vmem:[%s1349_s4 + $0x108] sm:$0xff] %v442_v58  ;;  %v445_v13 = vadd.f32 %v381_v61, %v317_v63  ;;  %v446_v14 = vadd.f32 %v382_v62, %v318_v0  ;;  %v319_v15 = vmax.f32 %v255_v2, 0.0  ;;  %v320_v16 = vmax.f32 %v256_v4, 0.0  ;;  %v392_v61 = vld [vmem:[%s1348_s1 + $0x178] sm:$0xff]  ;;  %v694_v0 = vld [vmem:[%s1345_s0 + $0xd0] sm:$0xff]  }
  0x34   :  { %507 = vst [vmem:[%s1349_s4 + $0x110] sm:$0xff] %v443_v6  ;;  %v189_v17 = vmul.f32 %v733_v1, %v623_v10  ;;  %v190_v18 = vmul.f32 %v733_v1, %v624_v11  ;;  %v627_v19 = vunpack.c.l.bf16 %v689_v5  ;;  %v628_v20 = vunpack.c.h.bf16 %v689_v5  ;;  %v695_v11 = vld [vmem:[%s1345_s0 + $0xd8] sm:$0xff]  }
  0x35   :  { %508 = vst [vmem:[%s1349_s4 + $0x118] sm:$0xff] %v444_v7  ;;  %v447_v22 = vadd.f32 %v383_v8, %v319_v15  ;;  %v448_v23 = vadd.f32 %v384_v9, %v320_v16  ;;  %v631_v24 = vunpack.c.l.bf16 %v690_v12  ;;  %v632_v25 = vunpack.c.h.bf16 %v690_v12 }
  0x36   :  { %509 = vst [vmem:[%s1349_s4 + $0x120] sm:$0xff] %v445_v13  ;;  %v257_v26 = vadd.f32 %v738_v3, %v189_v17  ;;  %v258_v27 = vadd.f32 %v738_v3, %v190_v18  ;;  %v191_v28 = vmul.f32 %v733_v1, %v627_v19  ;;  %v192_v29 = vmul.f32 %v733_v1, %v628_v20  ;;  %v393_v20 = vld [vmem:[%s1348_s1 + $0x180] sm:$0xff] }
  0x37   :  { %510 = vst [vmem:[%s1349_s4 + $0x128] sm:$0xff] %v446_v14  ;;  %v193_v32 = vmul.f32 %v733_v1, %v631_v24  ;;  %v194_v33 = vmul.f32 %v733_v1, %v632_v25  ;;  %v635_v34 = vunpack.c.l.bf16 %v691_v21  ;;  %v636_v35 = vunpack.c.h.bf16 %v691_v21  ;;  %v394_v21 = vld [vmem:[%s1348_s1 + $0x188] sm:$0xff] }
  0x38   :  { %511 = vst [vmem:[%s1349_s4 + $0x130] sm:$0xff] %v447_v22  ;;  %v321_v36 = vmax.f32 %v257_v26, 0.0  ;;  %v322_v37 = vmax.f32 %v258_v27, 0.0  ;;  %v259_v38 = vadd.f32 %v738_v3, %v191_v28  ;;  %v260_v39 = vadd.f32 %v738_v3, %v192_v29 }
  0x39   :  { %512 = vst [vmem:[%s1349_s4 + $0x138] sm:$0xff] %v448_v23  ;;  %v261_v42 = vadd.f32 %v738_v3, %v193_v32  ;;  %v262_v43 = vadd.f32 %v738_v3, %v194_v33  ;;  %v195_v44 = vmul.f32 %v733_v1, %v635_v34  ;;  %v196_v45 = vmul.f32 %v733_v1, %v636_v35 }
  0x3a   :  { %v449_v47 = vadd.f32 %v385_v30, %v321_v36  ;;  %v450_v48 = vadd.f32 %v386_v31, %v322_v37  ;;  %v323_v49 = vmax.f32 %v259_v38, 0.0  ;;  %v324_v50 = vmax.f32 %v260_v39, 0.0  ;;  %v395_v30 = vld [vmem:[%s1348_s1 + $0x190] sm:$0xff]  ;;  %v396_v31 = vld [vmem:[%s1348_s1 + $0x198] sm:$0xff]  ;;  %v696_v36 = vld [vmem:[%s1345_s0 + $0xe0] sm:$0xff]  }
  0x3b   :  { %v325_v53 = vmax.f32 %v261_v42, 0.0  ;;  %v326_v54 = vmax.f32 %v262_v43, 0.0  ;;  %v263_v55 = vadd.f32 %v738_v3, %v195_v44  ;;  %v264_v56 = vadd.f32 %v738_v3, %v196_v45  ;;  %v398_v42 = vld [vmem:[%s1348_s1 + $0x1a8] sm:$0xff] }
  0x3c   :  { %513 = vst [vmem:[%s1349_s4 + $0x140] sm:$0xff] %v449_v47  ;;  %v451_v58 = vadd.f32 %v387_v40, %v323_v49  ;;  %v452_v59 = vadd.f32 %v388_v41, %v324_v50  ;;  %v639_v62 = vunpack.c.l.bf16 %v692_v46  ;;  %v640_v63 = vunpack.c.h.bf16 %v692_v46  ;;  %v397_v41 = vld [vmem:[%s1348_s1 + $0x1a0] sm:$0xff]  ;;  %v697_v47 = vld [vmem:[%s1345_s0 + $0xe8] sm:$0xff]   ;;  %v399_v50 = vld [vmem:[%s1348_s1 + $0x1b0] sm:$0xff] }
  0x3d   :  { %514 = vst [vmem:[%s1349_s4 + $0x148] sm:$0xff] %v450_v48  ;;  %v453_v2 = vadd.f32 %v389_v51, %v325_v53  ;;  %v454_v4 = vadd.f32 %v390_v52, %v326_v54  ;;  %v327_v5 = vmax.f32 %v263_v55, 0.0  ;;  %v328_v6 = vmax.f32 %v264_v56, 0.0  ;;  %v400_v51 = vld [vmem:[%s1348_s1 + $0x1b8] sm:$0xff]  ;;  %v698_v54 = vld [vmem:[%s1345_s0 + $0xf0] sm:$0xff]  }
  0x3e   :  { %515 = vst [vmem:[%s1349_s4 + $0x150] sm:$0xff] %v451_v58  ;;  %v197_v7 = vmul.f32 %v733_v1, %v639_v62  ;;  %v198_v8 = vmul.f32 %v733_v1, %v640_v63  ;;  %v643_v9 = vunpack.c.l.bf16 %v693_v57  ;;  %v644_v10 = vunpack.c.h.bf16 %v693_v57  ;;  %v699_v63 = vld [vmem:[%s1345_s0 + $0xf8] sm:$0xff]  }
  0x3f   :  { %516 = vst [vmem:[%s1349_s4 + $0x158] sm:$0xff] %v452_v59  ;;  %v455_v12 = vadd.f32 %v391_v60, %v327_v5  ;;  %v456_v13 = vadd.f32 %v392_v61, %v328_v6  ;;  %v647_v14 = vunpack.c.l.bf16 %v694_v0  ;;  %v648_v15 = vunpack.c.h.bf16 %v694_v0 }
  0x40   :  { %517 = vst [vmem:[%s1349_s4 + $0x160] sm:$0xff] %v453_v2  ;;  %v265_v16 = vadd.f32 %v738_v3, %v197_v7  ;;  %v266_v17 = vadd.f32 %v738_v3, %v198_v8  ;;  %v199_v18 = vmul.f32 %v733_v1, %v643_v9  ;;  %v200_v19 = vmul.f32 %v733_v1, %v644_v10  ;;  %v401_v10 = vld [vmem:[%s1348_s1 + $0x1c0] sm:$0xff] }
  0x41   :  { %518 = vst [vmem:[%s1349_s4 + $0x168] sm:$0xff] %v454_v4  ;;  %v201_v22 = vmul.f32 %v733_v1, %v647_v14  ;;  %v202_v23 = vmul.f32 %v733_v1, %v648_v15  ;;  %v651_v24 = vunpack.c.l.bf16 %v695_v11  ;;  %v652_v25 = vunpack.c.h.bf16 %v695_v11  ;;  %v402_v11 = vld [vmem:[%s1348_s1 + $0x1c8] sm:$0xff] }
  0x42   :  { %519 = vst [vmem:[%s1349_s4 + $0x170] sm:$0xff] %v455_v12  ;;  %v329_v26 = vmax.f32 %v265_v16, 0.0  ;;  %v330_v27 = vmax.f32 %v266_v17, 0.0  ;;  %v267_v28 = vadd.f32 %v738_v3, %v199_v18  ;;  %v268_v29 = vadd.f32 %v738_v3, %v200_v19 }
  0x43   :  { %520 = vst [vmem:[%s1349_s4 + $0x178] sm:$0xff] %v456_v13  ;;  %v269_v32 = vadd.f32 %v738_v3, %v201_v22  ;;  %v270_v33 = vadd.f32 %v738_v3, %v202_v23  ;;  %v203_v34 = vmul.f32 %v733_v1, %v651_v24  ;;  %v204_v35 = vmul.f32 %v733_v1, %v652_v25 }
  0x44   :  { %v457_v37 = vadd.f32 %v393_v20, %v329_v26  ;;  %v458_v38 = vadd.f32 %v394_v21, %v330_v27  ;;  %v331_v39 = vmax.f32 %v267_v28, 0.0  ;;  %v332_v40 = vmax.f32 %v268_v29, 0.0  ;;  %v403_v20 = vld [vmem:[%s1348_s1 + $0x1d0] sm:$0xff]  ;;  %v404_v21 = vld [vmem:[%s1348_s1 + $0x1d8] sm:$0xff] }
  0x45   :  { %v333_v43 = vmax.f32 %v269_v32, 0.0  ;;  %v334_v44 = vmax.f32 %v270_v33, 0.0  ;;  %v271_v45 = vadd.f32 %v738_v3, %v203_v34  ;;  %v272_v46 = vadd.f32 %v738_v3, %v204_v35 }
  0x46   :  { %521 = vst [vmem:[%s1349_s4 + $0x180] sm:$0xff] %v457_v37  ;;  %v459_v48 = vadd.f32 %v395_v30, %v331_v39  ;;  %v460_v49 = vadd.f32 %v396_v31, %v332_v40  ;;  %v655_v52 = vunpack.c.l.bf16 %v696_v36  ;;  %v656_v53 = vunpack.c.h.bf16 %v696_v36  ;;  %v405_v30 = vld [vmem:[%s1348_s1 + $0x1e0] sm:$0xff]  ;;  %v406_v31 = vld [vmem:[%s1348_s1 + $0x1e8] sm:$0xff]  ;;  %v407_v37 = vld [vmem:[%s1348_s1 + $0x1f0] sm:$0xff] }
  0x47   :  { %522 = vst [vmem:[%s1349_s4 + $0x188] sm:$0xff] %v458_v38  ;;  %v461_v55 = vadd.f32 %v397_v41, %v333_v43  ;;  %v462_v56 = vadd.f32 %v398_v42, %v334_v44  ;;  %v335_v57 = vmax.f32 %v271_v45, 0.0  ;;  %v336_v58 = vmax.f32 %v272_v46, 0.0  ;;  %v408_v38 = vld [vmem:[%s1348_s1 + $0x1f8] sm:$0xff] }
  0x48   :  { %523 = vst [vmem:[%s1349_s4 + $0x190] sm:$0xff] %v459_v48  ;;  %v205_v59 = vmul.f32 %v733_v1, %v655_v52  ;;  %v206_v60 = vmul.f32 %v733_v1, %v656_v53  ;;  %v659_v61 = vunpack.c.l.bf16 %v697_v47  ;;  %v660_v62 = vunpack.c.h.bf16 %v697_v47 }
  0x49   :  { %524 = vst [vmem:[%s1349_s4 + $0x198] sm:$0xff] %v460_v49  ;;  %v463_v0 = vadd.f32 %v399_v50, %v335_v57  ;;  %v464_v2 = vadd.f32 %v400_v51, %v336_v58  ;;  %v663_v4 = vunpack.c.l.bf16 %v698_v54  ;;  %v664_v5 = vunpack.c.h.bf16 %v698_v54 }
  0x4a   :  { %525 = vst [vmem:[%s1349_s4 + $0x1a0] sm:$0xff] %v461_v55  ;;  %v273_v6 = vadd.f32 %v738_v3, %v205_v59  ;;  %v274_v7 = vadd.f32 %v738_v3, %v206_v60  ;;  %v207_v8 = vmul.f32 %v733_v1, %v659_v61  ;;  %v208_v9 = vmul.f32 %v733_v1, %v660_v62 }
  0x4b   :  { %526 = vst [vmem:[%s1349_s4 + $0x1a8] sm:$0xff] %v462_v56  ;;  %v209_v12 = vmul.f32 %v733_v1, %v663_v4  ;;  %v210_v13 = vmul.f32 %v733_v1, %v664_v5  ;;  %v667_v14 = vunpack.c.l.bf16 %v699_v63  ;;  %v668_v15 = vunpack.c.h.bf16 %v699_v63 }
  0x4c   :  { %527 = vst [vmem:[%s1349_s4 + $0x1b0] sm:$0xff] %v463_v0  ;;  %v337_v16 = vmax.f32 %v273_v6, 0.0  ;;  %v338_v17 = vmax.f32 %v274_v7, 0.0  ;;  %v275_v18 = vadd.f32 %v738_v3, %v207_v8  ;;  %v276_v19 = vadd.f32 %v738_v3, %v208_v9 }
  0x4d   :  { %528 = vst [vmem:[%s1349_s4 + $0x1b8] sm:$0xff] %v464_v2  ;;  %v277_v22 = vadd.f32 %v738_v3, %v209_v12  ;;  %v278_v23 = vadd.f32 %v738_v3, %v210_v13  ;;  %v211_v24 = vmul.f32 %v733_v1, %v667_v14  ;;  %v212_v25 = vmul.f32 %v733_v1, %v668_v15 }
  0x4e   :  { %v465_v26 = vadd.f32 %v401_v10, %v337_v16  ;;  %v466_v27 = vadd.f32 %v402_v11, %v338_v17  ;;  %v339_v28 = vmax.f32 %v275_v18, 0.0  ;;  %v340_v29 = vmax.f32 %v276_v19, 0.0 }
  0x4f   :  { %v341_v32 = vmax.f32 %v277_v22, 0.0  ;;  %v342_v33 = vmax.f32 %v278_v23, 0.0  ;;  %v279_v34 = vadd.f32 %v738_v3, %v211_v24  ;;  %v280_v35 = vadd.f32 %v738_v3, %v212_v25 }
  0x50   :  { %529 = vst [vmem:[%s1349_s4 + $0x1c0] sm:$0xff] %v465_v26  ;;  %v467_v1 = vadd.f32 %v403_v20, %v339_v28  ;;  %v468_v36 = vadd.f32 %v404_v21, %v340_v29 }
  0x51   :  { %530 = vst [vmem:[%s1349_s4 + $0x1c8] sm:$0xff] %v466_v27  ;;  %v469_v39 = vadd.f32 %v405_v30, %v341_v32  ;;  %v470_v3 = vadd.f32 %v406_v31, %v342_v33  ;;  %v343_v40 = vmax.f32 %v279_v34, 0.0  ;;  %v344_v41 = vmax.f32 %v280_v35, 0.0 }
  0x52   :  { %531 = vst [vmem:[%s1349_s4 + $0x1d0] sm:$0xff] %v467_v1 }
  0x53   :  { %532 = vst [vmem:[%s1349_s4 + $0x1d8] sm:$0xff] %v468_v36  ;;  %v471_v42 = vadd.f32 %v407_v37, %v343_v40  ;;  %v472_v43 = vadd.f32 %v408_v38, %v344_v41 }
  0x54   :  { %533 = vst [vmem:[%s1349_s4 + $0x1e0] sm:$0xff] %v469_v39 }
  0x55   :  { %534 = vst [vmem:[%s1349_s4 + $0x1e8] sm:$0xff] %v470_v3 }
  0x56   :  { %535 = vst [vmem:[%s1349_s4 + $0x1f0] sm:$0xff] %v471_v42 }
  0x57   :  { %536 = vst [vmem:[%s1349_s4 + $0x1f8] sm:$0xff] %v472_v43 }

</bundles_post_ra>
